<compile_context>
chip_gen: v7x
topology: tpu7x:2x2x1
jax: 0.10.0
libtpu: 0.0.40
codegen_flags: <defaults>
</compile_context>

<pallas_src>
import functools
import math

import jax
import jax.numpy as jnp
from jax.experimental import pallas as pl
from jax.experimental.pallas import tpu as pltpu


_VMEM_LIMIT = 32 * 1024 * 1024   # above v5e's 16 MiB scoped default; safe on v6e/v7x
_MASKED_BIAS = -10000.0          # matches the PyTorch module's masked_bias buffer


def _pick_tile(dim, target, align):
    """Largest multiple of `align` <= `target` that evenly divides `dim`; falls
    back to the full dimension (always a legal block: equal-to-array-dim)."""
    if dim <= target:
        return dim
    t = (target // align) * align
    while t >= align:
        if dim % t == 0:
            return t
        t -= align
    return dim


# ------------------------------ tiled linear -------------------------------- #
def _linear_kernel(x_ref, w_ref, b_ref, o_ref, acc_ref):
    # grid = (M/tm, N/tn, K/tk); K (reduction) is the innermost axis.
    @pl.when(pl.program_id(2) == 0)
    def _init():
        acc_ref[...] = jnp.zeros_like(acc_ref)

    # MXU consumes the native input dtype and accumulates in f32.
    acc_ref[...] += jnp.dot(x_ref[...], w_ref[...],
                            preferred_element_type=jnp.float32)

    @pl.when(pl.program_id(2) == pl.num_programs(2) - 1)
    def _finalize():
        o_ref[...] = (acc_ref[...]
                      + b_ref[...].astype(jnp.float32)).astype(o_ref.dtype)


def linear(x2d, w_io, b, *, tile_m=256, tile_n=256, tile_k=512):
    """x2d: [N, IN]; w_io: [IN, OUT] (pre-transposed once at setup); b: [OUT]."""
    n, din = x2d.shape
    dout = w_io.shape[1]
    tm = _pick_tile(n, tile_m, 8)
    tn = _pick_tile(dout, tile_n, 128)
    tk = _pick_tile(din, tile_k, 128)
    b2 = b.reshape(1, dout)
    return pl.pallas_call(
        _linear_kernel,
        out_shape=jax.ShapeDtypeStruct((n, dout), x2d.dtype),
        grid=(n // tm, dout // tn, din // tk),
        in_specs=[
            pl.BlockSpec((tm, tk), lambda i, j, k: (i, k)),
            pl.BlockSpec((tk, tn), lambda i, j, k: (k, j)),
            pl.BlockSpec((1, tn), lambda i, j, k: (0, j)),
        ],
        out_specs=pl.BlockSpec((tm, tn), lambda i, j, k: (i, j)),
        scratch_shapes=[pltpu.VMEM((tm, tn), jnp.float32)],
        compiler_params=pltpu.CompilerParams(
            dimension_semantics=("parallel", "parallel", "arbitrary"),
            vmem_limit_bytes=_VMEM_LIMIT,
        ),
    )(x2d, w_io, b2)


# ------------------------ flash-style causal attention ----------------------- #
def _flash_attn_kernel(q_ref, k_ref, v_ref, o_ref, m_sc, l_sc, acc_sc,
                       *, scale, num_heads):
    # q_ref: [tq, H, D]; k_ref/v_ref: [tk, H, D]; o_ref: [tq, H, D]
    tq = q_ref.shape[0]
    tk = k_ref.shape[0]
    ki = pl.program_id(2)
    nk = pl.num_programs(2)
    q_start = pl.program_id(1) * tq
    k_start = ki * tk

    @pl.when(ki == 0)
    def _init():
        m_sc[...] = jnp.full_like(m_sc, -jnp.inf)
        l_sc[...] = jnp.zeros_like(l_sc)
        acc_sc[...] = jnp.zeros_like(acc_sc)

    def _accumulate(apply_mask):
        keep = None
        if apply_mask:
            # Mask is computed once per (q,k) block, shared by all heads.
            t_idx = q_start + jax.lax.broadcasted_iota(jnp.int32, (tq, tk), 0)
            f_idx = k_start + jax.lax.broadcasted_iota(jnp.int32, (tq, tk), 1)
            keep = f_idx <= t_idx                      # key pos <= query pos
        for h in range(num_heads):                     # static unroll over heads
            q_h = q_ref[:, h, :]                       # [tq, D]
            k_h = k_ref[:, h, :]                       # [tk, D]
            v_h = v_ref[:, h, :]                       # [tk, D]
            # Contract the last dims: no explicit k.T is materialized.
            s = jax.lax.dot_general(
                q_h, k_h, (((1,), (1,)), ((), ())),
                preferred_element_type=jnp.float32) * scale
            if apply_mask:
                s = jnp.where(keep, s, _MASKED_BIAS)
            m_prev = m_sc[h]                                       # [tq, 1]
            m_new = jnp.maximum(m_prev, jnp.max(s, axis=-1, keepdims=True))
            alpha = jnp.exp(m_prev - m_new)
            p = jnp.exp(s - m_new)                                 # unnormalized
            l_sc[h] = alpha * l_sc[h] + jnp.sum(p, axis=-1, keepdims=True)
            acc_sc[h] = alpha * acc_sc[h] + jnp.dot(
                p.astype(v_h.dtype), v_h, preferred_element_type=jnp.float32)
            m_sc[h] = m_new

    # Causal block classification (per grid step, scalar):
    is_active = k_start <= q_start + (tq - 1)   # block contributes at all
    on_diag = k_start + (tk - 1) > q_start      # block straddles the diagonal

    @pl.when(jnp.logical_and(is_active, jnp.logical_not(on_diag)))
    def _full_block():                          # fully unmasked: mask-free path
        _accumulate(apply_mask=False)

    @pl.when(jnp.logical_and(is_active, on_diag))
    def _diag_block():                          # diagonal block: apply causal mask
        _accumulate(apply_mask=True)
    # fully-masked blocks (k_start > last query index) are skipped entirely.

    @pl.when(ki == nk - 1)
    def _finalize():
        # Deferred softmax normalization: scale the (tq x D) accumulator rather
        # than the (tq x tk) probabilities; reciprocal on the EUP (approx).
        for h in range(num_heads):
            inv = pl.reciprocal(l_sc[h], approx=True)
            o_ref[:, h, :] = (acc_sc[h] * inv).astype(o_ref.dtype)


def flash_attention(qkv, *, num_heads, head_size, block_q=128, block_k=128):
    """qkv: [B, S, 3, H, D] view of the c_attn output -> context [B, S, H, D]."""
    B, S, _, H, D = qkv.shape
    tq = _pick_tile(S, block_q, 8)
    tk = _pick_tile(S, block_k, 8)
    kernel = functools.partial(_flash_attn_kernel,
                               scale=1.0 / math.sqrt(head_size),
                               num_heads=H)
    return pl.pallas_call(
        kernel,
        out_shape=jax.ShapeDtypeStruct((B, S, H, D), qkv.dtype),
        grid=(B, S // tq, S // tk),
        in_specs=[
            # q / k / v are column regions (index 0/1/2 along the "3" axis) of
            # the same c_attn output view -- head split fused into index_maps.
            pl.BlockSpec((None, tq, None, H, D), lambda b, qi, ki: (b, qi, 0, 0, 0)),
            pl.BlockSpec((None, tk, None, H, D), lambda b, qi, ki: (b, ki, 1, 0, 0)),
            pl.BlockSpec((None, tk, None, H, D), lambda b, qi, ki: (b, ki, 2, 0, 0)),
        ],
        out_specs=pl.BlockSpec((None, tq, H, D), lambda b, qi, ki: (b, qi, 0, 0)),
        scratch_shapes=[
            pltpu.VMEM((H, tq, 1), jnp.float32),   # running max   (m)
            pltpu.VMEM((H, tq, 1), jnp.float32),   # running denom (l)
            pltpu.VMEM((H, tq, D), jnp.float32),   # unnormalized context (acc)
        ],
        compiler_params=pltpu.CompilerParams(
            dimension_semantics=("parallel", "parallel", "arbitrary"),
            vmem_limit_bytes=_VMEM_LIMIT,
        ),
    )(qkv, qkv, qkv)


# -------------------------------- full module -------------------------------- #
def prepare_params(torch_style_params):
    """One-time layout conversion from the PyTorch nn.Linear convention
    (weight [out_features, in_features]) to the kernel convention [in, out],
    so no per-forward-call weight transpose is materialized in HBM."""
    return {
        "c_attn_w": jnp.transpose(torch_style_params["c_attn_w"]),
        "c_attn_b": torch_style_params["c_attn_b"],
        "c_proj_w": jnp.transpose(torch_style_params["c_proj_w"]),
        "c_proj_b": torch_style_params["c_proj_b"],
    }


def gpt2_attention(encodings, params, num_heads):
    """GPT2Attention forward (attention_masks=None, past_key_values=None path).
    `params` hold pre-transposed ([in, out]) weights -- see prepare_params()."""
    # TODO(synk): attention_masks / past_key_values (KV-cache) not implemented.
    B, S, hidden = encodings.shape
    head_size = hidden // num_heads

    # c_attn: tiled, pipelined matmul + bias.
    cattn = linear(encodings.reshape(B * S, hidden),
                   params["c_attn_w"], params["c_attn_b"])      # [B*S, 3*hidden]

    # Layout-preserving (free) reshape; head split is done by the BlockSpecs.
    qkv = cattn.reshape(B, S, 3, num_heads, head_size)

    ctx = flash_attention(qkv, num_heads=num_heads, head_size=head_size)  # [B,S,H,D]

    # 'b h s c -> b s (h c)' is likewise just a free reshape of [B,S,H,D].
    out = linear(ctx.reshape(B * S, hidden),
                 params["c_proj_w"], params["c_proj_b"])
    return out.reshape(B, S, hidden)


if __name__ == "__main__":
    B, S, hidden, num_heads = 2, 8, 32, 4

    key = jax.random.PRNGKey(0)
    k1, k2, k3, k4, k5 = jax.random.split(key, 5)
    torch_params = {
        # PyTorch Linear layout: weight [out_features, in_features], bias [out]
        "c_attn_w": jax.random.normal(k1, (3 * hidden, hidden), jnp.float32) * 0.02,
        "c_attn_b": jax.random.normal(k2, (3 * hidden,), jnp.float32) * 0.02,
        "c_proj_w": jax.random.normal(k3, (hidden, hidden), jnp.float32) * 0.02,
        "c_proj_b": jax.random.normal(k4, (hidden,), jnp.float32) * 0.02,
    }
    params = prepare_params(torch_params)          # one-time weight transpose
    encodings = jax.random.normal(k5, (B, S, hidden), jnp.float32)

    fwd = jax.jit(functools.partial(gpt2_attention, num_heads=num_heads))
    out = fwd(encodings, params)
    jax.block_until_ready(out)
    assert out.shape == (B, S, hidden) and out.dtype == jnp.float32
    print("KERNEL_OK")
</pallas_src>

<mosaic_0001>
module attributes {stable_mosaic.version = 11 : i64} {
  func.func @_linear_kernel(%arg0: i32, %arg1: i32, %arg2: i32, %arg3: memref<16x32xf32, #tpu.memory_space<vmem>>, %arg4: memref<32x96xf32, #tpu.memory_space<vmem>>, %arg5: memref<1x96xf32, #tpu.memory_space<vmem>>, %arg6: memref<16x96xf32, #tpu.memory_space<vmem>>, %arg7: memref<16x96xf32, #tpu.memory_space<vmem>>) attributes {dimension_semantics = [#tpu.dimension_semantics<parallel>, #tpu.dimension_semantics<parallel>, #tpu.dimension_semantics<arbitrary>], iteration_bounds = array<i64: 1, 1, 1>, scalar_prefetch = 0 : i64, scratch_operands = 1 : i64, tpu.core_type = #tpu.core_type<tc>, window_params = [{transform_indices = @transform_0, window_bounds = array<i64: 16, 32>}, {transform_indices = @transform_1, window_bounds = array<i64: 32, 96>}, {transform_indices = @transform_2, window_bounds = array<i64: 1, 96>}, {transform_indices = @transform_3, window_bounds = array<i64: 16, 96>}]} {
    %c0_i32 = arith.constant 0 : i32
    %0 = arith.cmpi eq, %arg2, %c0_i32 : i32
    %1 = arith.extui %0 : i1 to i32
    %c0_i32_0 = arith.constant 0 : i32
    %2 = arith.cmpi ne, %1, %c0_i32_0 : i32
    scf.if %2 {
      %cst_10 = arith.constant 0.000000e+00 : f32
      %12 = vector.broadcast %cst_10 : f32 to vector<16x96xf32>
      %c0_11 = arith.constant 0 : index
      %c0_12 = arith.constant 0 : index
      %13 = vector.load %arg7[%c0_11, %c0_12] : memref<16x96xf32, #tpu.memory_space<vmem>>, vector<16x96xf32>
      tpu.vector_store %arg7[%c0_11, %c0_12], %12 {strides = array<i32>} : memref<16x96xf32, #tpu.memory_space<vmem>>, vector<16x96xf32>,
    } else {
    }
    %c0 = arith.constant 0 : index
    %c0_1 = arith.constant 0 : index
    %3 = vector.load %arg7[%c0, %c0_1] : memref<16x96xf32, #tpu.memory_space<vmem>>, vector<16x96xf32>
    %c0_2 = arith.constant 0 : index
    %c0_3 = arith.constant 0 : index
    %4 = vector.load %arg3[%c0_2, %c0_3] : memref<16x32xf32, #tpu.memory_space<vmem>>, vector<16x32xf32>
    %c0_4 = arith.constant 0 : index
    %c0_5 = arith.constant 0 : index
    %5 = vector.load %arg4[%c0_4, %c0_5] : memref<32x96xf32, #tpu.memory_space<vmem>>, vector<32x96xf32>
    %cst = arith.constant dense<0.000000e+00> : vector<16x96xf32>
    %6 = tpu.matmul %4, %5, %cst {dimension_numbers = #tpu.dot_dimension_numbers<[1], [0], [0], [1], [0, 0, 1, 1], [], []>} : vector<16x32xf32>, vector<32x96xf32>, vector<16x96xf32> -> vector<16x96xf32>
    %7 = arith.addf %3, %6 : vector<16x96xf32>
    %c0_6 = arith.constant 0 : index
    %c0_7 = arith.constant 0 : index
    %8 = vector.load %arg7[%c0_6, %c0_7] : memref<16x96xf32, #tpu.memory_space<vmem>>, vector<16x96xf32>
    tpu.vector_store %arg7[%c0_6, %c0_7], %7 {strides = array<i32>} : memref<16x96xf32, #tpu.memory_space<vmem>>, vector<16x96xf32>,
    %c0_i32_8 = arith.constant 0 : i32
    %9 = arith.cmpi eq, %arg2, %c0_i32_8 : i32
    %10 = arith.extui %9 : i1 to i32
    %c0_i32_9 = arith.constant 0 : i32
    %11 = arith.cmpi ne, %10, %c0_i32_9 : i32
    scf.if %11 {
      %c0_10 = arith.constant 0 : index
      %c0_11 = arith.constant 0 : index
      %12 = vector.load %arg7[%c0_10, %c0_11] : memref<16x96xf32, #tpu.memory_space<vmem>>, vector<16x96xf32>
      %c0_12 = arith.constant 0 : index
      %c0_13 = arith.constant 0 : index
      %13 = vector.load %arg5[%c0_12, %c0_13] : memref<1x96xf32, #tpu.memory_space<vmem>>, vector<1x96xf32>
      %14 = vector.broadcast %13 : vector<1x96xf32> to vector<16x96xf32>
      %15 = arith.addf %12, %14 : vector<16x96xf32>
      %c0_14 = arith.constant 0 : index
      %c0_15 = arith.constant 0 : index
      %16 = vector.load %arg6[%c0_14, %c0_15] : memref<16x96xf32, #tpu.memory_space<vmem>>, vector<16x96xf32>
      tpu.vector_store %arg6[%c0_14, %c0_15], %15 {strides = array<i32>} : memref<16x96xf32, #tpu.memory_space<vmem>>, vector<16x96xf32>,
    } else {
    }
    return
  }
  func.func @transform_0(%arg0: i32, %arg1: i32, %arg2: i32) -> (i32, i32) {
    %c0_i32 = arith.constant 0 : i32
    return %arg0, %arg2 : i32, i32
  }
  func.func @transform_1(%arg0: i32, %arg1: i32, %arg2: i32) -> (i32, i32) {
    %c0_i32 = arith.constant 0 : i32
    return %arg2, %arg1 : i32, i32
  }
  func.func @transform_2(%arg0: i32, %arg1: i32, %arg2: i32) -> (i32, i32) {
    %c0_i32 = arith.constant 0 : i32
    %c0_i32_0 = arith.constant 0 : i32
    return %c0_i32, %arg1 : i32, i32
  }
  func.func @transform_3(%arg0: i32, %arg1: i32, %arg2: i32) -> (i32, i32) {
    %c0_i32 = arith.constant 0 : i32
    return %arg0, %arg1 : i32, i32
  }
}

module attributes {stable_mosaic.version = 11 : i64} {
  func.func @_flash_attn_kernel(%arg0: i32, %arg1: i32, %arg2: i32, %arg3: memref<1x8x1x4x8xf32, #tpu.memory_space<vmem>>, %arg4: memref<1x8x1x4x8xf32, #tpu.memory_space<vmem>>, %arg5: memref<1x8x1x4x8xf32, #tpu.memory_space<vmem>>, %arg6: memref<1x8x4x8xf32, #tpu.memory_space<vmem>>, %arg7: memref<4x8x1xf32, #tpu.memory_space<vmem>>, %arg8: memref<4x8x1xf32, #tpu.memory_space<vmem>>, %arg9: memref<4x8x8xf32, #tpu.memory_space<vmem>>) attributes {dimension_semantics = [#tpu.dimension_semantics<parallel>, #tpu.dimension_semantics<parallel>, #tpu.dimension_semantics<arbitrary>], iteration_bounds = array<i64: 2, 1, 1>, scalar_prefetch = 0 : i64, scratch_operands = 3 : i64, tpu.core_type = #tpu.core_type<tc>, window_params = [{transform_indices = @transform_0, window_bounds = array<i64: 1, 8, 1, 4, 8>}, {transform_indices = @transform_1, window_bounds = array<i64: 1, 8, 1, 4, 8>}, {transform_indices = @transform_2, window_bounds = array<i64: 1, 8, 1, 4, 8>}, {transform_indices = @transform_3, window_bounds = array<i64: 1, 8, 4, 8>}]} {
    %c8_i32 = arith.constant 8 : i32
    %0 = arith.muli %arg1, %c8_i32 : i32
    %c8_i32_0 = arith.constant 8 : i32
    %1 = arith.muli %arg2, %c8_i32_0 : i32
    %c0_i32 = arith.constant 0 : i32
    %2 = arith.cmpi eq, %arg2, %c0_i32 : i32
    %3 = arith.extui %2 : i1 to i32
    %c0_i32_1 = arith.constant 0 : i32
    %4 = arith.cmpi ne, %3, %c0_i32_1 : i32
    scf.if %4 {
      %cst = arith.constant 0xFF800000 : f32
      %19 = vector.broadcast %cst : f32 to vector<4x8x1xf32>
      %c0 = arith.constant 0 : index
      %c0_7 = arith.constant 0 : index
      %c0_8 = arith.constant 0 : index
      %20 = vector.load %arg7[%c0, %c0_7, %c0_8] : memref<4x8x1xf32, #tpu.memory_space<vmem>>, vector<4x8x1xf32>
      tpu.vector_store %arg7[%c0, %c0_7, %c0_8], %19 {strides = array<i32>} : memref<4x8x1xf32, #tpu.memory_space<vmem>>, vector<4x8x1xf32>,
      %cst_9 = arith.constant 0.000000e+00 : f32
      %21 = vector.broadcast %cst_9 : f32 to vector<4x8x1xf32>
      %c0_10 = arith.constant 0 : index
      %c0_11 = arith.constant 0 : index
      %c0_12 = arith.constant 0 : index
      %22 = vector.load %arg8[%c0_10, %c0_11, %c0_12] : memref<4x8x1xf32, #tpu.memory_space<vmem>>, vector<4x8x1xf32>
      tpu.vector_store %arg8[%c0_10, %c0_11, %c0_12], %21 {strides = array<i32>} : memref<4x8x1xf32, #tpu.memory_space<vmem>>, vector<4x8x1xf32>,
      %cst_13 = arith.constant 0.000000e+00 : f32
      %23 = vector.broadcast %cst_13 : f32 to vector<4x8x8xf32>
      %c0_14 = arith.constant 0 : index
      %c0_15 = arith.constant 0 : index
      %c0_16 = arith.constant 0 : index
      %24 = vector.load %arg9[%c0_14, %c0_15, %c0_16] : memref<4x8x8xf32, #tpu.memory_space<vmem>>, vector<4x8x8xf32>
      tpu.vector_store %arg9[%c0_14, %c0_15, %c0_16], %23 {strides = array<i32>} : memref<4x8x8xf32, #tpu.memory_space<vmem>>, vector<4x8x8xf32>,
    } else {
    }
    %c7_i32 = arith.constant 7 : i32
    %5 = arith.addi %0, %c7_i32 : i32
    %6 = arith.cmpi sle, %1, %5 : i32
    %c7_i32_2 = arith.constant 7 : i32
    %7 = arith.addi %1, %c7_i32_2 : i32
    %8 = arith.cmpi sgt, %7, %0 : i32
    %true = arith.constant true
    %9 = arith.xori %8, %true : i1
    %10 = arith.andi %6, %9 : i1
    %11 = arith.extui %10 : i1 to i32
    %c0_i32_3 = arith.constant 0 : i32
    %12 = arith.cmpi ne, %11, %c0_i32_3 : i32
    scf.if %12 {
      %c0 = arith.constant 0 : index
      %c0_7 = arith.constant 0 : index
      %c0_8 = arith.constant 0 : index
      %c0_9 = arith.constant 0 : index
      %c0_10 = arith.constant 0 : index
      %19 = vector.load %arg3[%c0, %c0_7, %c0_8, %c0_9, %c0_10] : memref<1x8x1x4x8xf32, #tpu.memory_space<vmem>>, vector<1x8x1x1x8xf32>
      %20 = vector.shape_cast %19 : vector<1x8x1x1x8xf32> to vector<8x8xf32>
      %c0_11 = arith.constant 0 : index
      %c0_12 = arith.constant 0 : index
      %c0_13 = arith.constant 0 : index
      %c0_14 = arith.constant 0 : index
      %c0_15 = arith.constant 0 : index
      %21 = vector.load %arg4[%c0_11, %c0_12, %c0_13, %c0_14, %c0_15] : memref<1x8x1x4x8xf32, #tpu.memory_space<vmem>>, vector<1x8x1x1x8xf32>
      %22 = vector.shape_cast %21 : vector<1x8x1x1x8xf32> to vector<8x8xf32>
      %c0_16 = arith.constant 0 : index
      %c0_17 = arith.constant 0 : index
      %c0_18 = arith.constant 0 : index
      %c0_19 = arith.constant 0 : index
      %c0_20 = arith.constant 0 : index
      %23 = vector.load %arg5[%c0_16, %c0_17, %c0_18, %c0_19, %c0_20] : memref<1x8x1x4x8xf32, #tpu.memory_space<vmem>>, vector<1x8x1x1x8xf32>
      %24 = vector.shape_cast %23 : vector<1x8x1x1x8xf32> to vector<8x8xf32>
      %cst = arith.constant dense<0.000000e+00> : vector<8x8xf32>
      %25 = tpu.matmul %20, %22, %cst {dimension_numbers = #tpu.dot_dimension_numbers<[1], [1], [0], [0], [0, 0, 1, 0], [], []>} : vector<8x8xf32>, vector<8x8xf32>, vector<8x8xf32> -> vector<8x8xf32>
      %cst_21 = arith.constant 0.353553385 : f32
      %26 = vector.broadcast %cst_21 : f32 to vector<8x8xf32>
      %27 = arith.mulf %25, %26 : vector<8x8xf32>
      %c0_22 = arith.constant 0 : index
      %c0_23 = arith.constant 0 : index
      %c0_24 = arith.constant 0 : index
      %28 = vector.load %arg7[%c0_22, %c0_23, %c0_24] : memref<4x8x1xf32, #tpu.memory_space<vmem>>, vector<1x8x1xf32>
      %29 = vector.shape_cast %28 : vector<1x8x1xf32> to vector<8x1xf32>
      %cst_25 = arith.constant dense<0xFF800000> : vector<8xf32>
      %30 = vector.multi_reduction <maximumf>, %27, %cst_25 [1] : vector<8x8xf32> to vector<8xf32>
      %31 = vector.shape_cast %30 : vector<8xf32> to vector<8x1xf32>
      %32 = arith.maximumf %29, %31 : vector<8x1xf32>
      %33 = arith.subf %29, %32 : vector<8x1xf32>
      %34 = math.exp %33 : vector<8x1xf32>
      %35 = vector.broadcast %32 : vector<8x1xf32> to vector<8x8xf32>
      %36 = arith.subf %27, %35 : vector<8x8xf32>
      %37 = math.exp %36 : vector<8x8xf32>
      %c0_26 = arith.constant 0 : index
      %c0_27 = arith.constant 0 : index
      %c0_28 = arith.constant 0 : index
      %38 = vector.load %arg8[%c0_26, %c0_27, %c0_28] : memref<4x8x1xf32, #tpu.memory_space<vmem>>, vector<1x8x1xf32>
      %39 = vector.shape_cast %38 : vector<1x8x1xf32> to vector<8x1xf32>
      %40 = arith.mulf %34, %39 : vector<8x1xf32>
      %cst_29 = arith.constant dense<0.000000e+00> : vector<8xf32>
      %41 = vector.multi_reduction <add>, %37, %cst_29 [1] : vector<8x8xf32> to vector<8xf32>
      %42 = vector.shape_cast %41 : vector<8xf32> to vector<8x1xf32>
      %43 = arith.addf %40, %42 : vector<8x1xf32>
      %c0_30 = arith.constant 0 : index
      %c0_31 = arith.constant 0 : index
      %c0_32 = arith.constant 0 : index
      %44 = vector.load %arg8[%c0_30, %c0_31, %c0_32] : memref<4x8x1xf32, #tpu.memory_space<vmem>>, vector<1x8x1xf32>
      %45 = vector.shape_cast %44 : vector<1x8x1xf32> to vector<8x1xf32>
      %46 = vector.shape_cast %43 : vector<8x1xf32> to vector<1x8x1xf32>
      tpu.vector_store %arg8[%c0_30, %c0_31, %c0_32], %46 {strides = array<i32>} : memref<4x8x1xf32, #tpu.memory_space<vmem>>, vector<1x8x1xf32>,
      %c0_33 = arith.constant 0 : index
      %c0_34 = arith.constant 0 : index
      %c0_35 = arith.constant 0 : index
      %47 = vector.load %arg9[%c0_33, %c0_34, %c0_35] : memref<4x8x8xf32, #tpu.memory_space<vmem>>, vector<1x8x8xf32>
      %48 = vector.shape_cast %47 : vector<1x8x8xf32> to vector<8x8xf32>
      %49 = vector.broadcast %34 : vector<8x1xf32> to vector<8x8xf32>
      %50 = arith.mulf %49, %48 : vector<8x8xf32>
      %cst_36 = arith.constant dense<0.000000e+00> : vector<8x8xf32>
      %51 = tpu.matmul %37, %24, %cst_36 {dimension_numbers = #tpu.dot_dimension_numbers<[1], [0], [0], [1], [0, 0, 1, 1], [], []>} : vector<8x8xf32>, vector<8x8xf32>, vector<8x8xf32> -> vector<8x8xf32>
      %52 = arith.addf %50, %51 : vector<8x8xf32>
      %c0_37 = arith.constant 0 : index
      %c0_38 = arith.constant 0 : index
      %c0_39 = arith.constant 0 : index
      %53 = vector.load %arg9[%c0_37, %c0_38, %c0_39] : memref<4x8x8xf32, #tpu.memory_space<vmem>>, vector<1x8x8xf32>
      %54 = vector.shape_cast %53 : vector<1x8x8xf32> to vector<8x8xf32>
      %55 = vector.shape_cast %52 : vector<8x8xf32> to vector<1x8x8xf32>
      tpu.vector_store %arg9[%c0_37, %c0_38, %c0_39], %55 {strides = array<i32>} : memref<4x8x8xf32, #tpu.memory_space<vmem>>, vector<1x8x8xf32>,
      %c0_40 = arith.constant 0 : index
      %c0_41 = arith.constant 0 : index
      %c0_42 = arith.constant 0 : index
      %56 = vector.load %arg7[%c0_40, %c0_41, %c0_42] : memref<4x8x1xf32, #tpu.memory_space<vmem>>, vector<1x8x1xf32>
      %57 = vector.shape_cast %56 : vector<1x8x1xf32> to vector<8x1xf32>
      %58 = vector.shape_cast %32 : vector<8x1xf32> to vector<1x8x1xf32>
      tpu.vector_store %arg7[%c0_40, %c0_41, %c0_42], %58 {strides = array<i32>} : memref<4x8x1xf32, #tpu.memory_space<vmem>>, vector<1x8x1xf32>,
      %c0_43 = arith.constant 0 : index
      %c0_44 = arith.constant 0 : index
      %c0_45 = arith.constant 0 : index
      %c1 = arith.constant 1 : index
      %c0_46 = arith.constant 0 : index
      %59 = vector.load %arg3[%c0_43, %c0_44, %c0_45, %c1, %c0_46] : memref<1x8x1x4x8xf32, #tpu.memory_space<vmem>>, vector<1x8x1x1x8xf32>
      %60 = vector.shape_cast %59 : vector<1x8x1x1x8xf32> to vector<8x8xf32>
      %c0_47 = arith.constant 0 : index
      %c0_48 = arith.constant 0 : index
      %c0_49 = arith.constant 0 : index
      %c1_50 = arith.constant 1 : index
      %c0_51 = arith.constant 0 : index
      %61 = vector.load %arg4[%c0_47, %c0_48, %c0_49, %c1_50, %c0_51] : memref<1x8x1x4x8xf32, #tpu.memory_space<vmem>>, vector<1x8x1x1x8xf32>
      %62 = vector.shape_cast %61 : vector<1x8x1x1x8xf32> to vector<8x8xf32>
      %c0_52 = arith.constant 0 : index
      %c0_53 = arith.constant 0 : index
      %c0_54 = arith.constant 0 : index
      %c1_55 = arith.constant 1 : index
      %c0_56 = arith.constant 0 : index
      %63 = vector.load %arg5[%c0_52, %c0_53, %c0_54, %c1_55, %c0_56] : memref<1x8x1x4x8xf32, #tpu.memory_space<vmem>>, vector<1x8x1x1x8xf32>
      %64 = vector.shape_cast %63 : vector<1x8x1x1x8xf32> to vector<8x8xf32>
      %cst_57 = arith.constant dense<0.000000e+00> : vector<8x8xf32>
      %65 = tpu.matmul %60, %62, %cst_57 {dimension_numbers = #tpu.dot_dimension_numbers<[1], [1], [0], [0], [0, 0, 1, 0], [], []>} : vector<8x8xf32>, vector<8x8xf32>, vector<8x8xf32> -> vector<8x8xf32>
      %cst_58 = arith.constant 0.353553385 : f32
      %66 = vector.broadcast %cst_58 : f32 to vector<8x8xf32>
      %67 = arith.mulf %65, %66 : vector<8x8xf32>
      %c1_59 = arith.constant 1 : index
      %c0_60 = arith.constant 0 : index
      %c0_61 = arith.constant 0 : index
      %68 = vector.load %arg7[%c1_59, %c0_60, %c0_61] : memref<4x8x1xf32, #tpu.memory_space<vmem>>, vector<1x8x1xf32>
      %69 = vector.shape_cast %68 : vector<1x8x1xf32> to vector<8x1xf32>
      %cst_62 = arith.constant dense<0xFF800000> : vector<8xf32>
      %70 = vector.multi_reduction <maximumf>, %67, %cst_62 [1] : vector<8x8xf32> to vector<8xf32>
      %71 = vector.shape_cast %70 : vector<8xf32> to vector<8x1xf32>
      %72 = arith.maximumf %69, %71 : vector<8x1xf32>
      %73 = arith.subf %69, %72 : vector<8x1xf32>
      %74 = math.exp %73 : vector<8x1xf32>
      %75 = vector.broadcast %72 : vector<8x1xf32> to vector<8x8xf32>
      %76 = arith.subf %67, %75 : vector<8x8xf32>
      %77 = math.exp %76 : vector<8x8xf32>
      %c1_63 = arith.constant 1 : index
      %c0_64 = arith.constant 0 : index
      %c0_65 = arith.constant 0 : index
      %78 = vector.load %arg8[%c1_63, %c0_64, %c0_65] : memref<4x8x1xf32, #tpu.memory_space<vmem>>, vector<1x8x1xf32>
      %79 = vector.shape_cast %78 : vector<1x8x1xf32> to vector<8x1xf32>
      %80 = arith.mulf %74, %79 : vector<8x1xf32>
      %cst_66 = arith.constant dense<0.000000e+00> : vector<8xf32>
      %81 = vector.multi_reduction <add>, %77, %cst_66 [1] : vector<8x8xf32> to vector<8xf32>
      %82 = vector.shape_cast %81 : vector<8xf32> to vector<8x1xf32>
      %83 = arith.addf %80, %82 : vector<8x1xf32>
      %c1_67 = arith.constant 1 : index
      %c0_68 = arith.constant 0 : index
      %c0_69 = arith.constant 0 : index
      %84 = vector.load %arg8[%c1_67, %c0_68, %c0_69] : memref<4x8x1xf32, #tpu.memory_space<vmem>>, vector<1x8x1xf32>
      %85 = vector.shape_cast %84 : vector<1x8x1xf32> to vector<8x1xf32>
      %86 = vector.shape_cast %83 : vector<8x1xf32> to vector<1x8x1xf32>
      tpu.vector_store %arg8[%c1_67, %c0_68, %c0_69], %86 {strides = array<i32>} : memref<4x8x1xf32, #tpu.memory_space<vmem>>, vector<1x8x1xf32>,
      %c1_70 = arith.constant 1 : index
      %c0_71 = arith.constant 0 : index
      %c0_72 = arith.constant 0 : index
      %87 = vector.load %arg9[%c1_70, %c0_71, %c0_72] : memref<4x8x8xf32, #tpu.memory_space<vmem>>, vector<1x8x8xf32>
      %88 = vector.shape_cast %87 : vector<1x8x8xf32> to vector<8x8xf32>
      %89 = vector.broadcast %74 : vector<8x1xf32> to vector<8x8xf32>
      %90 = arith.mulf %89, %88 : vector<8x8xf32>
      %cst_73 = arith.constant dense<0.000000e+00> : vector<8x8xf32>
      %91 = tpu.matmul %77, %64, %cst_73 {dimension_numbers = #tpu.dot_dimension_numbers<[1], [0], [0], [1], [0, 0, 1, 1], [], []>} : vector<8x8xf32>, vector<8x8xf32>, vector<8x8xf32> -> vector<8x8xf32>
      %92 = arith.addf %90, %91 : vector<8x8xf32>
      %c1_74 = arith.constant 1 : index
      %c0_75 = arith.constant 0 : index
      %c0_76 = arith.constant 0 : index
      %93 = vector.load %arg9[%c1_74, %c0_75, %c0_76] : memref<4x8x8xf32, #tpu.memory_space<vmem>>, vector<1x8x8xf32>
      %94 = vector.shape_cast %93 : vector<1x8x8xf32> to vector<8x8xf32>
      %95 = vector.shape_cast %92 : vector<8x8xf32> to vector<1x8x8xf32>
      tpu.vector_store %arg9[%c1_74, %c0_75, %c0_76], %95 {strides = array<i32>} : memref<4x8x8xf32, #tpu.memory_space<vmem>>, vector<1x8x8xf32>,
      %c1_77 = arith.constant 1 : index
      %c0_78 = arith.constant 0 : index
      %c0_79 = arith.constant 0 : index
      %96 = vector.load %arg7[%c1_77, %c0_78, %c0_79] : memref<4x8x1xf32, #tpu.memory_space<vmem>>, vector<1x8x1xf32>
      %97 = vector.shape_cast %96 : vector<1x8x1xf32> to vector<8x1xf32>
      %98 = vector.shape_cast %72 : vector<8x1xf32> to vector<1x8x1xf32>
      tpu.vector_store %arg7[%c1_77, %c0_78, %c0_79], %98 {strides = array<i32>} : memref<4x8x1xf32, #tpu.memory_space<vmem>>, vector<1x8x1xf32>,
      %c0_80 = arith.constant 0 : index
      %c0_81 = arith.constant 0 : index
      %c0_82 = arith.constant 0 : index
      %c2 = arith.constant 2 : index
      %c0_83 = arith.constant 0 : index
      %99 = vector.load %arg3[%c0_80, %c0_81, %c0_82, %c2, %c0_83] : memref<1x8x1x4x8xf32, #tpu.memory_space<vmem>>, vector<1x8x1x1x8xf32>
      %100 = vector.shape_cast %99 : vector<1x8x1x1x8xf32> to vector<8x8xf32>
      %c0_84 = arith.constant 0 : index
      %c0_85 = arith.constant 0 : index
      %c0_86 = arith.constant 0 : index
      %c2_87 = arith.constant 2 : index
      %c0_88 = arith.constant 0 : index
      %101 = vector.load %arg4[%c0_84, %c0_85, %c0_86, %c2_87, %c0_88] : memref<1x8x1x4x8xf32, #tpu.memory_space<vmem>>, vector<1x8x1x1x8xf32>
      %102 = vector.shape_cast %101 : vector<1x8x1x1x8xf32> to vector<8x8xf32>
      %c0_89 = arith.constant 0 : index
      %c0_90 = arith.constant 0 : index
      %c0_91 = arith.constant 0 : index
      %c2_92 = arith.constant 2 : index
      %c0_93 = arith.constant 0 : index
      %103 = vector.load %arg5[%c0_89, %c0_90, %c0_91, %c2_92, %c0_93] : memref<1x8x1x4x8xf32, #tpu.memory_space<vmem>>, vector<1x8x1x1x8xf32>
      %104 = vector.shape_cast %103 : vector<1x8x1x1x8xf32> to vector<8x8xf32>
      %cst_94 = arith.constant dense<0.000000e+00> : vector<8x8xf32>
      %105 = tpu.matmul %100, %102, %cst_94 {dimension_numbers = #tpu.dot_dimension_numbers<[1], [1], [0], [0], [0, 0, 1, 0], [], []>} : vector<8x8xf32>, vector<8x8xf32>, vector<8x8xf32> -> vector<8x8xf32>
      %cst_95 = arith.constant 0.353553385 : f32
      %106 = vector.broadcast %cst_95 : f32 to vector<8x8xf32>
      %107 = arith.mulf %105, %106 : vector<8x8xf32>
      %c2_96 = arith.constant 2 : index
      %c0_97 = arith.constant 0 : index
      %c0_98 = arith.constant 0 : index
      %108 = vector.load %arg7[%c2_96, %c0_97, %c0_98] : memref<4x8x1xf32, #tpu.memory_space<vmem>>, vector<1x8x1xf32>
      %109 = vector.shape_cast %108 : vector<1x8x1xf32> to vector<8x1xf32>
      %cst_99 = arith.constant dense<0xFF800000> : vector<8xf32>
      %110 = vector.multi_reduction <maximumf>, %107, %cst_99 [1] : vector<8x8xf32> to vector<8xf32>
      %111 = vector.shape_cast %110 : vector<8xf32> to vector<8x1xf32>
      %112 = arith.maximumf %109, %111 : vector<8x1xf32>
      %113 = arith.subf %109, %112 : vector<8x1xf32>
      %114 = math.exp %113 : vector<8x1xf32>
      %115 = vector.broadcast %112 : vector<8x1xf32> to vector<8x8xf32>
      %116 = arith.subf %107, %115 : vector<8x8xf32>
      %117 = math.exp %116 : vector<8x8xf32>
      %c2_100 = arith.constant 2 : index
      %c0_101 = arith.constant 0 : index
      %c0_102 = arith.constant 0 : index
      %118 = vector.load %arg8[%c2_100, %c0_101, %c0_102] : memref<4x8x1xf32, #tpu.memory_space<vmem>>, vector<1x8x1xf32>
      %119 = vector.shape_cast %118 : vector<1x8x1xf32> to vector<8x1xf32>
      %120 = arith.mulf %114, %119 : vector<8x1xf32>
      %cst_103 = arith.constant dense<0.000000e+00> : vector<8xf32>
      %121 = vector.multi_reduction <add>, %117, %cst_103 [1] : vector<8x8xf32> to vector<8xf32>
      %122 = vector.shape_cast %121 : vector<8xf32> to vector<8x1xf32>
      %123 = arith.addf %120, %122 : vector<8x1xf32>
      %c2_104 = arith.constant 2 : index
      %c0_105 = arith.constant 0 : index
      %c0_106 = arith.constant 0 : index
      %124 = vector.load %arg8[%c2_104, %c0_105, %c0_106] : memref<4x8x1xf32, #tpu.memory_space<vmem>>, vector<1x8x1xf32>
      %125 = vector.shape_cast %124 : vector<1x8x1xf32> to vector<8x1xf32>
      %126 = vector.shape_cast %123 : vector<8x1xf32> to vector<1x8x1xf32>
      tpu.vector_store %arg8[%c2_104, %c0_105, %c0_106], %126 {strides = array<i32>} : memref<4x8x1xf32, #tpu.memory_space<vmem>>, vector<1x8x1xf32>,
      %c2_107 = arith.constant 2 : index
      %c0_108 = arith.constant 0 : index
      %c0_109 = arith.constant 0 : index
      %127 = vector.load %arg9[%c2_107, %c0_108, %c0_109] : memref<4x8x8xf32, #tpu.memory_space<vmem>>, vector<1x8x8xf32>
      %128 = vector.shape_cast %127 : vector<1x8x8xf32> to vector<8x8xf32>
      %129 = vector.broadcast %114 : vector<8x1xf32> to vector<8x8xf32>
      %130 = arith.mulf %129, %128 : vector<8x8xf32>
      %cst_110 = arith.constant dense<0.000000e+00> : vector<8x8xf32>
      %131 = tpu.matmul %117, %104, %cst_110 {dimension_numbers = #tpu.dot_dimension_numbers<[1], [0], [0], [1], [0, 0, 1, 1], [], []>} : vector<8x8xf32>, vector<8x8xf32>, vector<8x8xf32> -> vector<8x8xf32>
      %132 = arith.addf %130, %131 : vector<8x8xf32>
      %c2_111 = arith.constant 2 : index
      %c0_112 = arith.constant 0 : index
      %c0_113 = arith.constant 0 : index
      %133 = vector.load %arg9[%c2_111, %c0_112, %c0_113] : memref<4x8x8xf32, #tpu.memory_space<vmem>>, vector<1x8x8xf32>
      %134 = vector.shape_cast %133 : vector<1x8x8xf32> to vector<8x8xf32>
      %135 = vector.shape_cast %132 : vector<8x8xf32> to vector<1x8x8xf32>
      tpu.vector_store %arg9[%c2_111, %c0_112, %c0_113], %135 {strides = array<i32>} : memref<4x8x8xf32, #tpu.memory_space<vmem>>, vector<1x8x8xf32>,
      %c2_114 = arith.constant 2 : index
      %c0_115 = arith.constant 0 : index
      %c0_116 = arith.constant 0 : index
      %136 = vector.load %arg7[%c2_114, %c0_115, %c0_116] : memref<4x8x1xf32, #tpu.memory_space<vmem>>, vector<1x8x1xf32>
      %137 = vector.shape_cast %136 : vector<1x8x1xf32> to vector<8x1xf32>
      %138 = vector.shape_cast %112 : vector<8x1xf32> to vector<1x8x1xf32>
      tpu.vector_store %arg7[%c2_114, %c0_115, %c0_116], %138 {strides = array<i32>} : memref<4x8x1xf32, #tpu.memory_space<vmem>>, vector<1x8x1xf32>,
      %c0_117 = arith.constant 0 : index
      %c0_118 = arith.constant 0 : index
      %c0_119 = arith.constant 0 : index
      %c3 = arith.constant 3 : index
      %c0_120 = arith.constant 0 : index
      %139 = vector.load %arg3[%c0_117, %c0_118, %c0_119, %c3, %c0_120] : memref<1x8x1x4x8xf32, #tpu.memory_space<vmem>>, vector<1x8x1x1x8xf32>
      %140 = vector.shape_cast %139 : vector<1x8x1x1x8xf32> to vector<8x8xf32>
      %c0_121 = arith.constant 0 : index
      %c0_122 = arith.constant 0 : index
      %c0_123 = arith.constant 0 : index
      %c3_124 = arith.constant 3 : index
      %c0_125 = arith.constant 0 : index
      %141 = vector.load %arg4[%c0_121, %c0_122, %c0_123, %c3_124, %c0_125] : memref<1x8x1x4x8xf32, #tpu.memory_space<vmem>>, vector<1x8x1x1x8xf32>
      %142 = vector.shape_cast %141 : vector<1x8x1x1x8xf32> to vector<8x8xf32>
      %c0_126 = arith.constant 0 : index
      %c0_127 = arith.constant 0 : index
      %c0_128 = arith.constant 0 : index
      %c3_129 = arith.constant 3 : index
      %c0_130 = arith.constant 0 : index
      %143 = vector.load %arg5[%c0_126, %c0_127, %c0_128, %c3_129, %c0_130] : memref<1x8x1x4x8xf32, #tpu.memory_space<vmem>>, vector<1x8x1x1x8xf32>
      %144 = vector.shape_cast %143 : vector<1x8x1x1x8xf32> to vector<8x8xf32>
      %cst_131 = arith.constant dense<0.000000e+00> : vector<8x8xf32>
      %145 = tpu.matmul %140, %142, %cst_131 {dimension_numbers = #tpu.dot_dimension_numbers<[1], [1], [0], [0], [0, 0, 1, 0], [], []>} : vector<8x8xf32>, vector<8x8xf32>, vector<8x8xf32> -> vector<8x8xf32>
      %cst_132 = arith.constant 0.353553385 : f32
      %146 = vector.broadcast %cst_132 : f32 to vector<8x8xf32>
      %147 = arith.mulf %145, %146 : vector<8x8xf32>
      %c3_133 = arith.constant 3 : index
      %c0_134 = arith.constant 0 : index
      %c0_135 = arith.constant 0 : index
      %148 = vector.load %arg7[%c3_133, %c0_134, %c0_135] : memref<4x8x1xf32, #tpu.memory_space<vmem>>, vector<1x8x1xf32>
      %149 = vector.shape_cast %148 : vector<1x8x1xf32> to vector<8x1xf32>
      %cst_136 = arith.constant dense<0xFF800000> : vector<8xf32>
      %150 = vector.multi_reduction <maximumf>, %147, %cst_136 [1] : vector<8x8xf32> to vector<8xf32>
      %151 = vector.shape_cast %150 : vector<8xf32> to vector<8x1xf32>
      %152 = arith.maximumf %149, %151 : vector<8x1xf32>
      %153 = arith.subf %149, %152 : vector<8x1xf32>
      %154 = math.exp %153 : vector<8x1xf32>
      %155 = vector.broadcast %152 : vector<8x1xf32> to vector<8x8xf32>
      %156 = arith.subf %147, %155 : vector<8x8xf32>
      %157 = math.exp %156 : vector<8x8xf32>
      %c3_137 = arith.constant 3 : index
      %c0_138 = arith.constant 0 : index
      %c0_139 = arith.constant 0 : index
      %158 = vector.load %arg8[%c3_137, %c0_138, %c0_139] : memref<4x8x1xf32, #tpu.memory_space<vmem>>, vector<1x8x1xf32>
      %159 = vector.shape_cast %158 : vector<1x8x1xf32> to vector<8x1xf32>
      %160 = arith.mulf %154, %159 : vector<8x1xf32>
      %cst_140 = arith.constant dense<0.000000e+00> : vector<8xf32>
      %161 = vector.multi_reduction <add>, %157, %cst_140 [1] : vector<8x8xf32> to vector<8xf32>
      %162 = vector.shape_cast %161 : vector<8xf32> to vector<8x1xf32>
      %163 = arith.addf %160, %162 : vector<8x1xf32>
      %c3_141 = arith.constant 3 : index
      %c0_142 = arith.constant 0 : index
      %c0_143 = arith.constant 0 : index
      %164 = vector.load %arg8[%c3_141, %c0_142, %c0_143] : memref<4x8x1xf32, #tpu.memory_space<vmem>>, vector<1x8x1xf32>
      %165 = vector.shape_cast %164 : vector<1x8x1xf32> to vector<8x1xf32>
      %166 = vector.shape_cast %163 : vector<8x1xf32> to vector<1x8x1xf32>
      tpu.vector_store %arg8[%c3_141, %c0_142, %c0_143], %166 {strides = array<i32>} : memref<4x8x1xf32, #tpu.memory_space<vmem>>, vector<1x8x1xf32>,
      %c3_144 = arith.constant 3 : index
      %c0_145 = arith.constant 0 : index
      %c0_146 = arith.constant 0 : index
      %167 = vector.load %arg9[%c3_144, %c0_145, %c0_146] : memref<4x8x8xf32, #tpu.memory_space<vmem>>, vector<1x8x8xf32>
      %168 = vector.shape_cast %167 : vector<1x8x8xf32> to vector<8x8xf32>
      %169 = vector.broadcast %154 : vector<8x1xf32> to vector<8x8xf32>
      %170 = arith.mulf %169, %168 : vector<8x8xf32>
      %cst_147 = arith.constant dense<0.000000e+00> : vector<8x8xf32>
      %171 = tpu.matmul %157, %144, %cst_147 {dimension_numbers = #tpu.dot_dimension_numbers<[1], [0], [0], [1], [0, 0, 1, 1], [], []>} : vector<8x8xf32>, vector<8x8xf32>, vector<8x8xf32> -> vector<8x8xf32>
      %172 = arith.addf %170, %171 : vector<8x8xf32>
      %c3_148 = arith.constant 3 : index
      %c0_149 = arith.constant 0 : index
      %c0_150 = arith.constant 0 : index
      %173 = vector.load %arg9[%c3_148, %c0_149, %c0_150] : memref<4x8x8xf32, #tpu.memory_space<vmem>>, vector<1x8x8xf32>
      %174 = vector.shape_cast %173 : vector<1x8x8xf32> to vector<8x8xf32>
      %175 = vector.shape_cast %172 : vector<8x8xf32> to vector<1x8x8xf32>
      tpu.vector_store %arg9[%c3_148, %c0_149, %c0_150], %175 {strides = array<i32>} : memref<4x8x8xf32, #tpu.memory_space<vmem>>, vector<1x8x8xf32>,
      %c3_151 = arith.constant 3 : index
      %c0_152 = arith.constant 0 : index
      %c0_153 = arith.constant 0 : index
      %176 = vector.load %arg7[%c3_151, %c0_152, %c0_153] : memref<4x8x1xf32, #tpu.memory_space<vmem>>, vector<1x8x1xf32>
      %177 = vector.shape_cast %176 : vector<1x8x1xf32> to vector<8x1xf32>
      %178 = vector.shape_cast %152 : vector<8x1xf32> to vector<1x8x1xf32>
      tpu.vector_store %arg7[%c3_151, %c0_152, %c0_153], %178 {strides = array<i32>} : memref<4x8x1xf32, #tpu.memory_space<vmem>>, vector<1x8x1xf32>,
    } else {
    }
    %13 = arith.andi %6, %8 : i1
    %14 = arith.extui %13 : i1 to i32
    %c0_i32_4 = arith.constant 0 : i32
    %15 = arith.cmpi ne, %14, %c0_i32_4 : i32
    scf.if %15 {
      %19 = tpu.iota {dimensions = array<i32: 0>} : vector<8x8xi32>
      %20 = vector.broadcast %0 : i32 to vector<8x8xi32>
      %21 = arith.addi %20, %19 : vector<8x8xi32>
      %22 = tpu.iota {dimensions = array<i32: 1>} : vector<8x8xi32>
      %23 = vector.broadcast %1 : i32 to vector<8x8xi32>
      %24 = arith.addi %23, %22 : vector<8x8xi32>
      %25 = arith.cmpi sle, %24, %21 : vector<8x8xi32>
      %c0 = arith.constant 0 : index
      %c0_7 = arith.constant 0 : index
      %c0_8 = arith.constant 0 : index
      %c0_9 = arith.constant 0 : index
      %c0_10 = arith.constant 0 : index
      %26 = vector.load %arg3[%c0, %c0_7, %c0_8, %c0_9, %c0_10] : memref<1x8x1x4x8xf32, #tpu.memory_space<vmem>>, vector<1x8x1x1x8xf32>
      %27 = vector.shape_cast %26 : vector<1x8x1x1x8xf32> to vector<8x8xf32>
      %c0_11 = arith.constant 0 : index
      %c0_12 = arith.constant 0 : index
      %c0_13 = arith.constant 0 : index
      %c0_14 = arith.constant 0 : index
      %c0_15 = arith.constant 0 : index
      %28 = vector.load %arg4[%c0_11, %c0_12, %c0_13, %c0_14, %c0_15] : memref<1x8x1x4x8xf32, #tpu.memory_space<vmem>>, vector<1x8x1x1x8xf32>
      %29 = vector.shape_cast %28 : vector<1x8x1x1x8xf32> to vector<8x8xf32>
      %c0_16 = arith.constant 0 : index
      %c0_17 = arith.constant 0 : index
      %c0_18 = arith.constant 0 : index
      %c0_19 = arith.constant 0 : index
      %c0_20 = arith.constant 0 : index
      %30 = vector.load %arg5[%c0_16, %c0_17, %c0_18, %c0_19, %c0_20] : memref<1x8x1x4x8xf32, #tpu.memory_space<vmem>>, vector<1x8x1x1x8xf32>
      %31 = vector.shape_cast %30 : vector<1x8x1x1x8xf32> to vector<8x8xf32>
      %cst = arith.constant dense<0.000000e+00> : vector<8x8xf32>
      %32 = tpu.matmul %27, %29, %cst {dimension_numbers = #tpu.dot_dimension_numbers<[1], [1], [0], [0], [0, 0, 1, 0], [], []>} : vector<8x8xf32>, vector<8x8xf32>, vector<8x8xf32> -> vector<8x8xf32>
      %cst_21 = arith.constant 0.353553385 : f32
      %33 = vector.broadcast %cst_21 : f32 to vector<8x8xf32>
      %34 = arith.mulf %32, %33 : vector<8x8xf32>
      %cst_22 = arith.constant -1.000000e+04 : f32
      %35 = vector.broadcast %cst_22 : f32 to vector<8x8xf32>
      %36 = arith.select %25, %34, %35 : vector<8x8xi1>, vector<8x8xf32>
      %c0_23 = arith.constant 0 : index
      %c0_24 = arith.constant 0 : index
      %c0_25 = arith.constant 0 : index
      %37 = vector.load %arg7[%c0_23, %c0_24, %c0_25] : memref<4x8x1xf32, #tpu.memory_space<vmem>>, vector<1x8x1xf32>
      %38 = vector.shape_cast %37 : vector<1x8x1xf32> to vector<8x1xf32>
      %cst_26 = arith.constant dense<0xFF800000> : vector<8xf32>
      %39 = vector.multi_reduction <maximumf>, %36, %cst_26 [1] : vector<8x8xf32> to vector<8xf32>
      %40 = vector.shape_cast %39 : vector<8xf32> to vector<8x1xf32>
      %41 = arith.maximumf %38, %40 : vector<8x1xf32>
      %42 = arith.subf %38, %41 : vector<8x1xf32>
      %43 = math.exp %42 : vector<8x1xf32>
      %44 = vector.broadcast %41 : vector<8x1xf32> to vector<8x8xf32>
      %45 = arith.subf %36, %44 : vector<8x8xf32>
      %46 = math.exp %45 : vector<8x8xf32>
      %c0_27 = arith.constant 0 : index
      %c0_28 = arith.constant 0 : index
      %c0_29 = arith.constant 0 : index
      %47 = vector.load %arg8[%c0_27, %c0_28, %c0_29] : memref<4x8x1xf32, #tpu.memory_space<vmem>>, vector<1x8x1xf32>
      %48 = vector.shape_cast %47 : vector<1x8x1xf32> to vector<8x1xf32>
      %49 = arith.mulf %43, %48 : vector<8x1xf32>
      %cst_30 = arith.constant dense<0.000000e+00> : vector<8xf32>
      %50 = vector.multi_reduction <add>, %46, %cst_30 [1] : vector<8x8xf32> to vector<8xf32>
      %51 = vector.shape_cast %50 : vector<8xf32> to vector<8x1xf32>
      %52 = arith.addf %49, %51 : vector<8x1xf32>
      %c0_31 = arith.constant 0 : index
      %c0_32 = arith.constant 0 : index
      %c0_33 = arith.constant 0 : index
      %53 = vector.load %arg8[%c0_31, %c0_32, %c0_33] : memref<4x8x1xf32, #tpu.memory_space<vmem>>, vector<1x8x1xf32>
      %54 = vector.shape_cast %53 : vector<1x8x1xf32> to vector<8x1xf32>
      %55 = vector.shape_cast %52 : vector<8x1xf32> to vector<1x8x1xf32>
      tpu.vector_store %arg8[%c0_31, %c0_32, %c0_33], %55 {strides = array<i32>} : memref<4x8x1xf32, #tpu.memory_space<vmem>>, vector<1x8x1xf32>,
      %c0_34 = arith.constant 0 : index
      %c0_35 = arith.constant 0 : index
      %c0_36 = arith.constant 0 : index
      %56 = vector.load %arg9[%c0_34, %c0_35, %c0_36] : memref<4x8x8xf32, #tpu.memory_space<vmem>>, vector<1x8x8xf32>
      %57 = vector.shape_cast %56 : vector<1x8x8xf32> to vector<8x8xf32>
      %58 = vector.broadcast %43 : vector<8x1xf32> to vector<8x8xf32>
      %59 = arith.mulf %58, %57 : vector<8x8xf32>
      %cst_37 = arith.constant dense<0.000000e+00> : vector<8x8xf32>
      %60 = tpu.matmul %46, %31, %cst_37 {dimension_numbers = #tpu.dot_dimension_numbers<[1], [0], [0], [1], [0, 0, 1, 1], [], []>} : vector<8x8xf32>, vector<8x8xf32>, vector<8x8xf32> -> vector<8x8xf32>
      %61 = arith.addf %59, %60 : vector<8x8xf32>
      %c0_38 = arith.constant 0 : index
      %c0_39 = arith.constant 0 : index
      %c0_40 = arith.constant 0 : index
      %62 = vector.load %arg9[%c0_38, %c0_39, %c0_40] : memref<4x8x8xf32, #tpu.memory_space<vmem>>, vector<1x8x8xf32>
      %63 = vector.shape_cast %62 : vector<1x8x8xf32> to vector<8x8xf32>
      %64 = vector.shape_cast %61 : vector<8x8xf32> to vector<1x8x8xf32>
      tpu.vector_store %arg9[%c0_38, %c0_39, %c0_40], %64 {strides = array<i32>} : memref<4x8x8xf32, #tpu.memory_space<vmem>>, vector<1x8x8xf32>,
      %c0_41 = arith.constant 0 : index
      %c0_42 = arith.constant 0 : index
      %c0_43 = arith.constant 0 : index
      %65 = vector.load %arg7[%c0_41, %c0_42, %c0_43] : memref<4x8x1xf32, #tpu.memory_space<vmem>>, vector<1x8x1xf32>
      %66 = vector.shape_cast %65 : vector<1x8x1xf32> to vector<8x1xf32>
      %67 = vector.shape_cast %41 : vector<8x1xf32> to vector<1x8x1xf32>
      tpu.vector_store %arg7[%c0_41, %c0_42, %c0_43], %67 {strides = array<i32>} : memref<4x8x1xf32, #tpu.memory_space<vmem>>, vector<1x8x1xf32>,
      %c0_44 = arith.constant 0 : index
      %c0_45 = arith.constant 0 : index
      %c0_46 = arith.constant 0 : index
      %c1 = arith.constant 1 : index
      %c0_47 = arith.constant 0 : index
      %68 = vector.load %arg3[%c0_44, %c0_45, %c0_46, %c1, %c0_47] : memref<1x8x1x4x8xf32, #tpu.memory_space<vmem>>, vector<1x8x1x1x8xf32>
      %69 = vector.shape_cast %68 : vector<1x8x1x1x8xf32> to vector<8x8xf32>
      %c0_48 = arith.constant 0 : index
      %c0_49 = arith.constant 0 : index
      %c0_50 = arith.constant 0 : index
      %c1_51 = arith.constant 1 : index
      %c0_52 = arith.constant 0 : index
      %70 = vector.load %arg4[%c0_48, %c0_49, %c0_50, %c1_51, %c0_52] : memref<1x8x1x4x8xf32, #tpu.memory_space<vmem>>, vector<1x8x1x1x8xf32>
      %71 = vector.shape_cast %70 : vector<1x8x1x1x8xf32> to vector<8x8xf32>
      %c0_53 = arith.constant 0 : index
      %c0_54 = arith.constant 0 : index
      %c0_55 = arith.constant 0 : index
      %c1_56 = arith.constant 1 : index
      %c0_57 = arith.constant 0 : index
      %72 = vector.load %arg5[%c0_53, %c0_54, %c0_55, %c1_56, %c0_57] : memref<1x8x1x4x8xf32, #tpu.memory_space<vmem>>, vector<1x8x1x1x8xf32>
      %73 = vector.shape_cast %72 : vector<1x8x1x1x8xf32> to vector<8x8xf32>
      %cst_58 = arith.constant dense<0.000000e+00> : vector<8x8xf32>
      %74 = tpu.matmul %69, %71, %cst_58 {dimension_numbers = #tpu.dot_dimension_numbers<[1], [1], [0], [0], [0, 0, 1, 0], [], []>} : vector<8x8xf32>, vector<8x8xf32>, vector<8x8xf32> -> vector<8x8xf32>
      %cst_59 = arith.constant 0.353553385 : f32
      %75 = vector.broadcast %cst_59 : f32 to vector<8x8xf32>
      %76 = arith.mulf %74, %75 : vector<8x8xf32>
      %cst_60 = arith.constant -1.000000e+04 : f32
      %77 = vector.broadcast %cst_60 : f32 to vector<8x8xf32>
      %78 = arith.select %25, %76, %77 : vector<8x8xi1>, vector<8x8xf32>
      %c1_61 = arith.constant 1 : index
      %c0_62 = arith.constant 0 : index
      %c0_63 = arith.constant 0 : index
      %79 = vector.load %arg7[%c1_61, %c0_62, %c0_63] : memref<4x8x1xf32, #tpu.memory_space<vmem>>, vector<1x8x1xf32>
      %80 = vector.shape_cast %79 : vector<1x8x1xf32> to vector<8x1xf32>
      %cst_64 = arith.constant dense<0xFF800000> : vector<8xf32>
      %81 = vector.multi_reduction <maximumf>, %78, %cst_64 [1] : vector<8x8xf32> to vector<8xf32>
      %82 = vector.shape_cast %81 : vector<8xf32> to vector<8x1xf32>
      %83 = arith.maximumf %80, %82 : vector<8x1xf32>
      %84 = arith.subf %80, %83 : vector<8x1xf32>
      %85 = math.exp %84 : vector<8x1xf32>
      %86 = vector.broadcast %83 : vector<8x1xf32> to vector<8x8xf32>
      %87 = arith.subf %78, %86 : vector<8x8xf32>
      %88 = math.exp %87 : vector<8x8xf32>
      %c1_65 = arith.constant 1 : index
      %c0_66 = arith.constant 0 : index
      %c0_67 = arith.constant 0 : index
      %89 = vector.load %arg8[%c1_65, %c0_66, %c0_67] : memref<4x8x1xf32, #tpu.memory_space<vmem>>, vector<1x8x1xf32>
      %90 = vector.shape_cast %89 : vector<1x8x1xf32> to vector<8x1xf32>
      %91 = arith.mulf %85, %90 : vector<8x1xf32>
      %cst_68 = arith.constant dense<0.000000e+00> : vector<8xf32>
      %92 = vector.multi_reduction <add>, %88, %cst_68 [1] : vector<8x8xf32> to vector<8xf32>
      %93 = vector.shape_cast %92 : vector<8xf32> to vector<8x1xf32>
      %94 = arith.addf %91, %93 : vector<8x1xf32>
      %c1_69 = arith.constant 1 : index
      %c0_70 = arith.constant 0 : index
      %c0_71 = arith.constant 0 : index
      %95 = vector.load %arg8[%c1_69, %c0_70, %c0_71] : memref<4x8x1xf32, #tpu.memory_space<vmem>>, vector<1x8x1xf32>
      %96 = vector.shape_cast %95 : vector<1x8x1xf32> to vector<8x1xf32>
      %97 = vector.shape_cast %94 : vector<8x1xf32> to vector<1x8x1xf32>
      tpu.vector_store %arg8[%c1_69, %c0_70, %c0_71], %97 {strides = array<i32>} : memref<4x8x1xf32, #tpu.memory_space<vmem>>, vector<1x8x1xf32>,
      %c1_72 = arith.constant 1 : index
      %c0_73 = arith.constant 0 : index
      %c0_74 = arith.constant 0 : index
      %98 = vector.load %arg9[%c1_72, %c0_73, %c0_74] : memref<4x8x8xf32, #tpu.memory_space<vmem>>, vector<1x8x8xf32>
      %99 = vector.shape_cast %98 : vector<1x8x8xf32> to vector<8x8xf32>
      %100 = vector.broadcast %85 : vector<8x1xf32> to vector<8x8xf32>
      %101 = arith.mulf %100, %99 : vector<8x8xf32>
      %cst_75 = arith.constant dense<0.000000e+00> : vector<8x8xf32>
      %102 = tpu.matmul %88, %73, %cst_75 {dimension_numbers = #tpu.dot_dimension_numbers<[1], [0], [0], [1], [0, 0, 1, 1], [], []>} : vector<8x8xf32>, vector<8x8xf32>, vector<8x8xf32> -> vector<8x8xf32>
      %103 = arith.addf %101, %102 : vector<8x8xf32>
      %c1_76 = arith.constant 1 : index
      %c0_77 = arith.constant 0 : index
      %c0_78 = arith.constant 0 : index
      %104 = vector.load %arg9[%c1_76, %c0_77, %c0_78] : memref<4x8x8xf32, #tpu.memory_space<vmem>>, vector<1x8x8xf32>
      %105 = vector.shape_cast %104 : vector<1x8x8xf32> to vector<8x8xf32>
      %106 = vector.shape_cast %103 : vector<8x8xf32> to vector<1x8x8xf32>
      tpu.vector_store %arg9[%c1_76, %c0_77, %c0_78], %106 {strides = array<i32>} : memref<4x8x8xf32, #tpu.memory_space<vmem>>, vector<1x8x8xf32>,
      %c1_79 = arith.constant 1 : index
      %c0_80 = arith.constant 0 : index
      %c0_81 = arith.constant 0 : index
      %107 = vector.load %arg7[%c1_79, %c0_80, %c0_81] : memref<4x8x1xf32, #tpu.memory_space<vmem>>, vector<1x8x1xf32>
      %108 = vector.shape_cast %107 : vector<1x8x1xf32> to vector<8x1xf32>
      %109 = vector.shape_cast %83 : vector<8x1xf32> to vector<1x8x1xf32>
      tpu.vector_store %arg7[%c1_79, %c0_80, %c0_81], %109 {strides = array<i32>} : memref<4x8x1xf32, #tpu.memory_space<vmem>>, vector<1x8x1xf32>,
      %c0_82 = arith.constant 0 : index
      %c0_83 = arith.constant 0 : index
      %c0_84 = arith.constant 0 : index
      %c2 = arith.constant 2 : index
      %c0_85 = arith.constant 0 : index
      %110 = vector.load %arg3[%c0_82, %c0_83, %c0_84, %c2, %c0_85] : memref<1x8x1x4x8xf32, #tpu.memory_space<vmem>>, vector<1x8x1x1x8xf32>
      %111 = vector.shape_cast %110 : vector<1x8x1x1x8xf32> to vector<8x8xf32>
      %c0_86 = arith.constant 0 : index
      %c0_87 = arith.constant 0 : index
      %c0_88 = arith.constant 0 : index
      %c2_89 = arith.constant 2 : index
      %c0_90 = arith.constant 0 : index
      %112 = vector.load %arg4[%c0_86, %c0_87, %c0_88, %c2_89, %c0_90] : memref<1x8x1x4x8xf32, #tpu.memory_space<vmem>>, vector<1x8x1x1x8xf32>
      %113 = vector.shape_cast %112 : vector<1x8x1x1x8xf32> to vector<8x8xf32>
      %c0_91 = arith.constant 0 : index
      %c0_92 = arith.constant 0 : index
      %c0_93 = arith.constant 0 : index
      %c2_94 = arith.constant 2 : index
      %c0_95 = arith.constant 0 : index
      %114 = vector.load %arg5[%c0_91, %c0_92, %c0_93, %c2_94, %c0_95] : memref<1x8x1x4x8xf32, #tpu.memory_space<vmem>>, vector<1x8x1x1x8xf32>
      %115 = vector.shape_cast %114 : vector<1x8x1x1x8xf32> to vector<8x8xf32>
      %cst_96 = arith.constant dense<0.000000e+00> : vector<8x8xf32>
      %116 = tpu.matmul %111, %113, %cst_96 {dimension_numbers = #tpu.dot_dimension_numbers<[1], [1], [0], [0], [0, 0, 1, 0], [], []>} : vector<8x8xf32>, vector<8x8xf32>, vector<8x8xf32> -> vector<8x8xf32>
      %cst_97 = arith.constant 0.353553385 : f32
      %117 = vector.broadcast %cst_97 : f32 to vector<8x8xf32>
      %118 = arith.mulf %116, %117 : vector<8x8xf32>
      %cst_98 = arith.constant -1.000000e+04 : f32
      %119 = vector.broadcast %cst_98 : f32 to vector<8x8xf32>
      %120 = arith.select %25, %118, %119 : vector<8x8xi1>, vector<8x8xf32>
      %c2_99 = arith.constant 2 : index
      %c0_100 = arith.constant 0 : index
      %c0_101 = arith.constant 0 : index
      %121 = vector.load %arg7[%c2_99, %c0_100, %c0_101] : memref<4x8x1xf32, #tpu.memory_space<vmem>>, vector<1x8x1xf32>
      %122 = vector.shape_cast %121 : vector<1x8x1xf32> to vector<8x1xf32>
      %cst_102 = arith.constant dense<0xFF800000> : vector<8xf32>
      %123 = vector.multi_reduction <maximumf>, %120, %cst_102 [1] : vector<8x8xf32> to vector<8xf32>
      %124 = vector.shape_cast %123 : vector<8xf32> to vector<8x1xf32>
      %125 = arith.maximumf %122, %124 : vector<8x1xf32>
      %126 = arith.subf %122, %125 : vector<8x1xf32>
      %127 = math.exp %126 : vector<8x1xf32>
      %128 = vector.broadcast %125 : vector<8x1xf32> to vector<8x8xf32>
      %129 = arith.subf %120, %128 : vector<8x8xf32>
      %130 = math.exp %129 : vector<8x8xf32>
      %c2_103 = arith.constant 2 : index
      %c0_104 = arith.constant 0 : index
      %c0_105 = arith.constant 0 : index
      %131 = vector.load %arg8[%c2_103, %c0_104, %c0_105] : memref<4x8x1xf32, #tpu.memory_space<vmem>>, vector<1x8x1xf32>
      %132 = vector.shape_cast %131 : vector<1x8x1xf32> to vector<8x1xf32>
      %133 = arith.mulf %127, %132 : vector<8x1xf32>
      %cst_106 = arith.constant dense<0.000000e+00> : vector<8xf32>
      %134 = vector.multi_reduction <add>, %130, %cst_106 [1] : vector<8x8xf32> to vector<8xf32>
      %135 = vector.shape_cast %134 : vector<8xf32> to vector<8x1xf32>
      %136 = arith.addf %133, %135 : vector<8x1xf32>
      %c2_107 = arith.constant 2 : index
      %c0_108 = arith.constant 0 : index
      %c0_109 = arith.constant 0 : index
      %137 = vector.load %arg8[%c2_107, %c0_108, %c0_109] : memref<4x8x1xf32, #tpu.memory_space<vmem>>, vector<1x8x1xf32>
      %138 = vector.shape_cast %137 : vector<1x8x1xf32> to vector<8x1xf32>
      %139 = vector.shape_cast %136 : vector<8x1xf32> to vector<1x8x1xf32>
      tpu.vector_store %arg8[%c2_107, %c0_108, %c0_109], %139 {strides = array<i32>} : memref<4x8x1xf32, #tpu.memory_space<vmem>>, vector<1x8x1xf32>,
      %c2_110 = arith.constant 2 : index
      %c0_111 = arith.constant 0 : index
      %c0_112 = arith.constant 0 : index
      %140 = vector.load %arg9[%c2_110, %c0_111, %c0_112] : memref<4x8x8xf32, #tpu.memory_space<vmem>>, vector<1x8x8xf32>
      %141 = vector.shape_cast %140 : vector<1x8x8xf32> to vector<8x8xf32>
      %142 = vector.broadcast %127 : vector<8x1xf32> to vector<8x8xf32>
      %143 = arith.mulf %142, %141 : vector<8x8xf32>
      %cst_113 = arith.constant dense<0.000000e+00> : vector<8x8xf32>
      %144 = tpu.matmul %130, %115, %cst_113 {dimension_numbers = #tpu.dot_dimension_numbers<[1], [0], [0], [1], [0, 0, 1, 1], [], []>} : vector<8x8xf32>, vector<8x8xf32>, vector<8x8xf32> -> vector<8x8xf32>
      %145 = arith.addf %143, %144 : vector<8x8xf32>
      %c2_114 = arith.constant 2 : index
      %c0_115 = arith.constant 0 : index
      %c0_116 = arith.constant 0 : index
      %146 = vector.load %arg9[%c2_114, %c0_115, %c0_116] : memref<4x8x8xf32, #tpu.memory_space<vmem>>, vector<1x8x8xf32>
      %147 = vector.shape_cast %146 : vector<1x8x8xf32> to vector<8x8xf32>
      %148 = vector.shape_cast %145 : vector<8x8xf32> to vector<1x8x8xf32>
      tpu.vector_store %arg9[%c2_114, %c0_115, %c0_116], %148 {strides = array<i32>} : memref<4x8x8xf32, #tpu.memory_space<vmem>>, vector<1x8x8xf32>,
      %c2_117 = arith.constant 2 : index
      %c0_118 = arith.constant 0 : index
      %c0_119 = arith.constant 0 : index
      %149 = vector.load %arg7[%c2_117, %c0_118, %c0_119] : memref<4x8x1xf32, #tpu.memory_space<vmem>>, vector<1x8x1xf32>
      %150 = vector.shape_cast %149 : vector<1x8x1xf32> to vector<8x1xf32>
      %151 = vector.shape_cast %125 : vector<8x1xf32> to vector<1x8x1xf32>
      tpu.vector_store %arg7[%c2_117, %c0_118, %c0_119], %151 {strides = array<i32>} : memref<4x8x1xf32, #tpu.memory_space<vmem>>, vector<1x8x1xf32>,
      %c0_120 = arith.constant 0 : index
      %c0_121 = arith.constant 0 : index
      %c0_122 = arith.constant 0 : index
      %c3 = arith.constant 3 : index
      %c0_123 = arith.constant 0 : index
      %152 = vector.load %arg3[%c0_120, %c0_121, %c0_122, %c3, %c0_123] : memref<1x8x1x4x8xf32, #tpu.memory_space<vmem>>, vector<1x8x1x1x8xf32>
      %153 = vector.shape_cast %152 : vector<1x8x1x1x8xf32> to vector<8x8xf32>
      %c0_124 = arith.constant 0 : index
      %c0_125 = arith.constant 0 : index
      %c0_126 = arith.constant 0 : index
      %c3_127 = arith.constant 3 : index
      %c0_128 = arith.constant 0 : index
      %154 = vector.load %arg4[%c0_124, %c0_125, %c0_126, %c3_127, %c0_128] : memref<1x8x1x4x8xf32, #tpu.memory_space<vmem>>, vector<1x8x1x1x8xf32>
      %155 = vector.shape_cast %154 : vector<1x8x1x1x8xf32> to vector<8x8xf32>
      %c0_129 = arith.constant 0 : index
      %c0_130 = arith.constant 0 : index
      %c0_131 = arith.constant 0 : index
      %c3_132 = arith.constant 3 : index
      %c0_133 = arith.constant 0 : index
      %156 = vector.load %arg5[%c0_129, %c0_130, %c0_131, %c3_132, %c0_133] : memref<1x8x1x4x8xf32, #tpu.memory_space<vmem>>, vector<1x8x1x1x8xf32>
      %157 = vector.shape_cast %156 : vector<1x8x1x1x8xf32> to vector<8x8xf32>
      %cst_134 = arith.constant dense<0.000000e+00> : vector<8x8xf32>
      %158 = tpu.matmul %153, %155, %cst_134 {dimension_numbers = #tpu.dot_dimension_numbers<[1], [1], [0], [0], [0, 0, 1, 0], [], []>} : vector<8x8xf32>, vector<8x8xf32>, vector<8x8xf32> -> vector<8x8xf32>
      %cst_135 = arith.constant 0.353553385 : f32
      %159 = vector.broadcast %cst_135 : f32 to vector<8x8xf32>
      %160 = arith.mulf %158, %159 : vector<8x8xf32>
      %cst_136 = arith.constant -1.000000e+04 : f32
      %161 = vector.broadcast %cst_136 : f32 to vector<8x8xf32>
      %162 = arith.select %25, %160, %161 : vector<8x8xi1>, vector<8x8xf32>
      %c3_137 = arith.constant 3 : index
      %c0_138 = arith.constant 0 : index
      %c0_139 = arith.constant 0 : index
      %163 = vector.load %arg7[%c3_137, %c0_138, %c0_139] : memref<4x8x1xf32, #tpu.memory_space<vmem>>, vector<1x8x1xf32>
      %164 = vector.shape_cast %163 : vector<1x8x1xf32> to vector<8x1xf32>
      %cst_140 = arith.constant dense<0xFF800000> : vector<8xf32>
      %165 = vector.multi_reduction <maximumf>, %162, %cst_140 [1] : vector<8x8xf32> to vector<8xf32>
      %166 = vector.shape_cast %165 : vector<8xf32> to vector<8x1xf32>
      %167 = arith.maximumf %164, %166 : vector<8x1xf32>
      %168 = arith.subf %164, %167 : vector<8x1xf32>
      %169 = math.exp %168 : vector<8x1xf32>
      %170 = vector.broadcast %167 : vector<8x1xf32> to vector<8x8xf32>
      %171 = arith.subf %162, %170 : vector<8x8xf32>
      %172 = math.exp %171 : vector<8x8xf32>
      %c3_141 = arith.constant 3 : index
      %c0_142 = arith.constant 0 : index
      %c0_143 = arith.constant 0 : index
      %173 = vector.load %arg8[%c3_141, %c0_142, %c0_143] : memref<4x8x1xf32, #tpu.memory_space<vmem>>, vector<1x8x1xf32>
      %174 = vector.shape_cast %173 : vector<1x8x1xf32> to vector<8x1xf32>
      %175 = arith.mulf %169, %174 : vector<8x1xf32>
      %cst_144 = arith.constant dense<0.000000e+00> : vector<8xf32>
      %176 = vector.multi_reduction <add>, %172, %cst_144 [1] : vector<8x8xf32> to vector<8xf32>
      %177 = vector.shape_cast %176 : vector<8xf32> to vector<8x1xf32>
      %178 = arith.addf %175, %177 : vector<8x1xf32>
      %c3_145 = arith.constant 3 : index
      %c0_146 = arith.constant 0 : index
      %c0_147 = arith.constant 0 : index
      %179 = vector.load %arg8[%c3_145, %c0_146, %c0_147] : memref<4x8x1xf32, #tpu.memory_space<vmem>>, vector<1x8x1xf32>
      %180 = vector.shape_cast %179 : vector<1x8x1xf32> to vector<8x1xf32>
      %181 = vector.shape_cast %178 : vector<8x1xf32> to vector<1x8x1xf32>
      tpu.vector_store %arg8[%c3_145, %c0_146, %c0_147], %181 {strides = array<i32>} : memref<4x8x1xf32, #tpu.memory_space<vmem>>, vector<1x8x1xf32>,
      %c3_148 = arith.constant 3 : index
      %c0_149 = arith.constant 0 : index
      %c0_150 = arith.constant 0 : index
      %182 = vector.load %arg9[%c3_148, %c0_149, %c0_150] : memref<4x8x8xf32, #tpu.memory_space<vmem>>, vector<1x8x8xf32>
      %183 = vector.shape_cast %182 : vector<1x8x8xf32> to vector<8x8xf32>
      %184 = vector.broadcast %169 : vector<8x1xf32> to vector<8x8xf32>
      %185 = arith.mulf %184, %183 : vector<8x8xf32>
      %cst_151 = arith.constant dense<0.000000e+00> : vector<8x8xf32>
      %186 = tpu.matmul %172, %157, %cst_151 {dimension_numbers = #tpu.dot_dimension_numbers<[1], [0], [0], [1], [0, 0, 1, 1], [], []>} : vector<8x8xf32>, vector<8x8xf32>, vector<8x8xf32> -> vector<8x8xf32>
      %187 = arith.addf %185, %186 : vector<8x8xf32>
      %c3_152 = arith.constant 3 : index
      %c0_153 = arith.constant 0 : index
      %c0_154 = arith.constant 0 : index
      %188 = vector.load %arg9[%c3_152, %c0_153, %c0_154] : memref<4x8x8xf32, #tpu.memory_space<vmem>>, vector<1x8x8xf32>
      %189 = vector.shape_cast %188 : vector<1x8x8xf32> to vector<8x8xf32>
      %190 = vector.shape_cast %187 : vector<8x8xf32> to vector<1x8x8xf32>
      tpu.vector_store %arg9[%c3_152, %c0_153, %c0_154], %190 {strides = array<i32>} : memref<4x8x8xf32, #tpu.memory_space<vmem>>, vector<1x8x8xf32>,
      %c3_155 = arith.constant 3 : index
      %c0_156 = arith.constant 0 : index
      %c0_157 = arith.constant 0 : index
      %191 = vector.load %arg7[%c3_155, %c0_156, %c0_157] : memref<4x8x1xf32, #tpu.memory_space<vmem>>, vector<1x8x1xf32>
      %192 = vector.shape_cast %191 : vector<1x8x1xf32> to vector<8x1xf32>
      %193 = vector.shape_cast %167 : vector<8x1xf32> to vector<1x8x1xf32>
      tpu.vector_store %arg7[%c3_155, %c0_156, %c0_157], %193 {strides = array<i32>} : memref<4x8x1xf32, #tpu.memory_space<vmem>>, vector<1x8x1xf32>,
    } else {
    }
    %c0_i32_5 = arith.constant 0 : i32
    %16 = arith.cmpi eq, %arg2, %c0_i32_5 : i32
    %17 = arith.extui %16 : i1 to i32
    %c0_i32_6 = arith.constant 0 : i32
    %18 = arith.cmpi ne, %17, %c0_i32_6 : i32
    scf.if %18 {
      %c0 = arith.constant 0 : index
      %c0_7 = arith.constant 0 : index
      %c0_8 = arith.constant 0 : index
      %19 = vector.load %arg8[%c0, %c0_7, %c0_8] : memref<4x8x1xf32, #tpu.memory_space<vmem>>, vector<1x8x1xf32>
      %20 = vector.shape_cast %19 : vector<1x8x1xf32> to vector<8x1xf32>
      %21 = tpu.reciprocal %20 {approx = true} : vector<8x1xf32> -> vector<8x1xf32>
      %c0_9 = arith.constant 0 : index
      %c0_10 = arith.constant 0 : index
      %c0_11 = arith.constant 0 : index
      %22 = vector.load %arg9[%c0_9, %c0_10, %c0_11] : memref<4x8x8xf32, #tpu.memory_space<vmem>>, vector<1x8x8xf32>
      %23 = vector.shape_cast %22 : vector<1x8x8xf32> to vector<8x8xf32>
      %24 = vector.broadcast %21 : vector<8x1xf32> to vector<8x8xf32>
      %25 = arith.mulf %23, %24 : vector<8x8xf32>
      %c0_12 = arith.constant 0 : index
      %c0_13 = arith.constant 0 : index
      %c0_14 = arith.constant 0 : index
      %c0_15 = arith.constant 0 : index
      %26 = vector.load %arg6[%c0_12, %c0_13, %c0_14, %c0_15] : memref<1x8x4x8xf32, #tpu.memory_space<vmem>>, vector<1x8x1x8xf32>
      %27 = vector.shape_cast %26 : vector<1x8x1x8xf32> to vector<8x8xf32>
      %28 = vector.shape_cast %25 : vector<8x8xf32> to vector<1x8x1x8xf32>
      tpu.vector_store %arg6[%c0_12, %c0_13, %c0_14, %c0_15], %28 {strides = array<i32>} : memref<1x8x4x8xf32, #tpu.memory_space<vmem>>, vector<1x8x1x8xf32>,
      %c1 = arith.constant 1 : index
      %c0_16 = arith.constant 0 : index
      %c0_17 = arith.constant 0 : index
      %29 = vector.load %arg8[%c1, %c0_16, %c0_17] : memref<4x8x1xf32, #tpu.memory_space<vmem>>, vector<1x8x1xf32>
      %30 = vector.shape_cast %29 : vector<1x8x1xf32> to vector<8x1xf32>
      %31 = tpu.reciprocal %30 {approx = true} : vector<8x1xf32> -> vector<8x1xf32>
      %c1_18 = arith.constant 1 : index
      %c0_19 = arith.constant 0 : index
      %c0_20 = arith.constant 0 : index
      %32 = vector.load %arg9[%c1_18, %c0_19, %c0_20] : memref<4x8x8xf32, #tpu.memory_space<vmem>>, vector<1x8x8xf32>
      %33 = vector.shape_cast %32 : vector<1x8x8xf32> to vector<8x8xf32>
      %34 = vector.broadcast %31 : vector<8x1xf32> to vector<8x8xf32>
      %35 = arith.mulf %33, %34 : vector<8x8xf32>
      %c0_21 = arith.constant 0 : index
      %c0_22 = arith.constant 0 : index
      %c1_23 = arith.constant 1 : index
      %c0_24 = arith.constant 0 : index
      %36 = vector.load %arg6[%c0_21, %c0_22, %c1_23, %c0_24] : memref<1x8x4x8xf32, #tpu.memory_space<vmem>>, vector<1x8x1x8xf32>
      %37 = vector.shape_cast %36 : vector<1x8x1x8xf32> to vector<8x8xf32>
      %38 = vector.shape_cast %35 : vector<8x8xf32> to vector<1x8x1x8xf32>
      tpu.vector_store %arg6[%c0_21, %c0_22, %c1_23, %c0_24], %38 {strides = array<i32>} : memref<1x8x4x8xf32, #tpu.memory_space<vmem>>, vector<1x8x1x8xf32>,
      %c2 = arith.constant 2 : index
      %c0_25 = arith.constant 0 : index
      %c0_26 = arith.constant 0 : index
      %39 = vector.load %arg8[%c2, %c0_25, %c0_26] : memref<4x8x1xf32, #tpu.memory_space<vmem>>, vector<1x8x1xf32>
      %40 = vector.shape_cast %39 : vector<1x8x1xf32> to vector<8x1xf32>
      %41 = tpu.reciprocal %40 {approx = true} : vector<8x1xf32> -> vector<8x1xf32>
      %c2_27 = arith.constant 2 : index
      %c0_28 = arith.constant 0 : index
      %c0_29 = arith.constant 0 : index
      %42 = vector.load %arg9[%c2_27, %c0_28, %c0_29] : memref<4x8x8xf32, #tpu.memory_space<vmem>>, vector<1x8x8xf32>
      %43 = vector.shape_cast %42 : vector<1x8x8xf32> to vector<8x8xf32>
      %44 = vector.broadcast %41 : vector<8x1xf32> to vector<8x8xf32>
      %45 = arith.mulf %43, %44 : vector<8x8xf32>
      %c0_30 = arith.constant 0 : index
      %c0_31 = arith.constant 0 : index
      %c2_32 = arith.constant 2 : index
      %c0_33 = arith.constant 0 : index
      %46 = vector.load %arg6[%c0_30, %c0_31, %c2_32, %c0_33] : memref<1x8x4x8xf32, #tpu.memory_space<vmem>>, vector<1x8x1x8xf32>
      %47 = vector.shape_cast %46 : vector<1x8x1x8xf32> to vector<8x8xf32>
      %48 = vector.shape_cast %45 : vector<8x8xf32> to vector<1x8x1x8xf32>
      tpu.vector_store %arg6[%c0_30, %c0_31, %c2_32, %c0_33], %48 {strides = array<i32>} : memref<1x8x4x8xf32, #tpu.memory_space<vmem>>, vector<1x8x1x8xf32>,
      %c3 = arith.constant 3 : index
      %c0_34 = arith.constant 0 : index
      %c0_35 = arith.constant 0 : index
      %49 = vector.load %arg8[%c3, %c0_34, %c0_35] : memref<4x8x1xf32, #tpu.memory_space<vmem>>, vector<1x8x1xf32>
      %50 = vector.shape_cast %49 : vector<1x8x1xf32> to vector<8x1xf32>
      %51 = tpu.reciprocal %50 {approx = true} : vector<8x1xf32> -> vector<8x1xf32>
      %c3_36 = arith.constant 3 : index
      %c0_37 = arith.constant 0 : index
      %c0_38 = arith.constant 0 : index
      %52 = vector.load %arg9[%c3_36, %c0_37, %c0_38] : memref<4x8x8xf32, #tpu.memory_space<vmem>>, vector<1x8x8xf32>
      %53 = vector.shape_cast %52 : vector<1x8x8xf32> to vector<8x8xf32>
      %54 = vector.broadcast %51 : vector<8x1xf32> to vector<8x8xf32>
      %55 = arith.mulf %53, %54 : vector<8x8xf32>
      %c0_39 = arith.constant 0 : index
      %c0_40 = arith.constant 0 : index
      %c3_41 = arith.constant 3 : index
      %c0_42 = arith.constant 0 : index
      %56 = vector.load %arg6[%c0_39, %c0_40, %c3_41, %c0_42] : memref<1x8x4x8xf32, #tpu.memory_space<vmem>>, vector<1x8x1x8xf32>
      %57 = vector.shape_cast %56 : vector<1x8x1x8xf32> to vector<8x8xf32>
      %58 = vector.shape_cast %55 : vector<8x8xf32> to vector<1x8x1x8xf32>
      tpu.vector_store %arg6[%c0_39, %c0_40, %c3_41, %c0_42], %58 {strides = array<i32>} : memref<1x8x4x8xf32, #tpu.memory_space<vmem>>, vector<1x8x1x8xf32>,
    } else {
    }
    return
  }
  func.func @transform_0(%arg0: i32, %arg1: i32, %arg2: i32) -> (i32, i32, i32, i32, i32) {
    %c0_i32 = arith.constant 0 : i32
    %c0_i32_0 = arith.constant 0 : i32
    %c0_i32_1 = arith.constant 0 : i32
    %c0_i32_2 = arith.constant 0 : i32
    return %arg0, %arg1, %c0_i32, %c0_i32_0, %c0_i32_1 : i32, i32, i32, i32, i32
  }
  func.func @transform_1(%arg0: i32, %arg1: i32, %arg2: i32) -> (i32, i32, i32, i32, i32) {
    %c1_i32 = arith.constant 1 : i32
    %c0_i32 = arith.constant 0 : i32
    %c0_i32_0 = arith.constant 0 : i32
    %c0_i32_1 = arith.constant 0 : i32
    return %arg0, %arg2, %c1_i32, %c0_i32, %c0_i32_0 : i32, i32, i32, i32, i32
  }
  func.func @transform_2(%arg0: i32, %arg1: i32, %arg2: i32) -> (i32, i32, i32, i32, i32) {
    %c2_i32 = arith.constant 2 : i32
    %c0_i32 = arith.constant 0 : i32
    %c0_i32_0 = arith.constant 0 : i32
    %c0_i32_1 = arith.constant 0 : i32
    return %arg0, %arg2, %c2_i32, %c0_i32, %c0_i32_0 : i32, i32, i32, i32, i32
  }
  func.func @transform_3(%arg0: i32, %arg1: i32, %arg2: i32) -> (i32, i32, i32, i32) {
    %c0_i32 = arith.constant 0 : i32
    %c0_i32_0 = arith.constant 0 : i32
    %c0_i32_1 = arith.constant 0 : i32
    return %arg0, %arg1, %c0_i32, %c0_i32_0 : i32, i32, i32, i32
  }
}

module attributes {stable_mosaic.version = 11 : i64} {
  func.func @_linear_kernel(%arg0: i32, %arg1: i32, %arg2: i32, %arg3: memref<16x32xf32, #tpu.memory_space<vmem>>, %arg4: memref<32x32xf32, #tpu.memory_space<vmem>>, %arg5: memref<1x32xf32, #tpu.memory_space<vmem>>, %arg6: memref<16x32xf32, #tpu.memory_space<vmem>>, %arg7: memref<16x32xf32, #tpu.memory_space<vmem>>) attributes {dimension_semantics = [#tpu.dimension_semantics<parallel>, #tpu.dimension_semantics<parallel>, #tpu.dimension_semantics<arbitrary>], iteration_bounds = array<i64: 1, 1, 1>, scalar_prefetch = 0 : i64, scratch_operands = 1 : i64, tpu.core_type = #tpu.core_type<tc>, window_params = [{transform_indices = @transform_0, window_bounds = array<i64: 16, 32>}, {transform_indices = @transform_1, window_bounds = array<i64: 32, 32>}, {transform_indices = @transform_2, window_bounds = array<i64: 1, 32>}, {transform_indices = @transform_3, window_bounds = array<i64: 16, 32>}]} {
    %c0_i32 = arith.constant 0 : i32
    %0 = arith.cmpi eq, %arg2, %c0_i32 : i32
    %1 = arith.extui %0 : i1 to i32
    %c0_i32_0 = arith.constant 0 : i32
    %2 = arith.cmpi ne, %1, %c0_i32_0 : i32
    scf.if %2 {
      %cst_10 = arith.constant 0.000000e+00 : f32
      %12 = vector.broadcast %cst_10 : f32 to vector<16x32xf32>
      %c0_11 = arith.constant 0 : index
      %c0_12 = arith.constant 0 : index
      %13 = vector.load %arg7[%c0_11, %c0_12] : memref<16x32xf32, #tpu.memory_space<vmem>>, vector<16x32xf32>
      tpu.vector_store %arg7[%c0_11, %c0_12], %12 {strides = array<i32>} : memref<16x32xf32, #tpu.memory_space<vmem>>, vector<16x32xf32>,
    } else {
    }
    %c0 = arith.constant 0 : index
    %c0_1 = arith.constant 0 : index
    %3 = vector.load %arg7[%c0, %c0_1] : memref<16x32xf32, #tpu.memory_space<vmem>>, vector<16x32xf32>
    %c0_2 = arith.constant 0 : index
    %c0_3 = arith.constant 0 : index
    %4 = vector.load %arg3[%c0_2, %c0_3] : memref<16x32xf32, #tpu.memory_space<vmem>>, vector<16x32xf32>
    %c0_4 = arith.constant 0 : index
    %c0_5 = arith.constant 0 : index
    %5 = vector.load %arg4[%c0_4, %c0_5] : memref<32x32xf32, #tpu.memory_space<vmem>>, vector<32x32xf32>
    %cst = arith.constant dense<0.000000e+00> : vector<16x32xf32>
    %6 = tpu.matmul %4, %5, %cst {dimension_numbers = #tpu.dot_dimension_numbers<[1], [0], [0], [1], [0, 0, 1, 1], [], []>} : vector<16x32xf32>, vector<32x32xf32>, vector<16x32xf32> -> vector<16x32xf32>
    %7 = arith.addf %3, %6 : vector<16x32xf32>
    %c0_6 = arith.constant 0 : index
    %c0_7 = arith.constant 0 : index
    %8 = vector.load %arg7[%c0_6, %c0_7] : memref<16x32xf32, #tpu.memory_space<vmem>>, vector<16x32xf32>
    tpu.vector_store %arg7[%c0_6, %c0_7], %7 {strides = array<i32>} : memref<16x32xf32, #tpu.memory_space<vmem>>, vector<16x32xf32>,
    %c0_i32_8 = arith.constant 0 : i32
    %9 = arith.cmpi eq, %arg2, %c0_i32_8 : i32
    %10 = arith.extui %9 : i1 to i32
    %c0_i32_9 = arith.constant 0 : i32
    %11 = arith.cmpi ne, %10, %c0_i32_9 : i32
    scf.if %11 {
      %c0_10 = arith.constant 0 : index
      %c0_11 = arith.constant 0 : index
      %12 = vector.load %arg7[%c0_10, %c0_11] : memref<16x32xf32, #tpu.memory_space<vmem>>, vector<16x32xf32>
      %c0_12 = arith.constant 0 : index
      %c0_13 = arith.constant 0 : index
      %13 = vector.load %arg5[%c0_12, %c0_13] : memref<1x32xf32, #tpu.memory_space<vmem>>, vector<1x32xf32>
      %14 = vector.broadcast %13 : vector<1x32xf32> to vector<16x32xf32>
      %15 = arith.addf %12, %14 : vector<16x32xf32>
      %c0_14 = arith.constant 0 : index
      %c0_15 = arith.constant 0 : index
      %16 = vector.load %arg6[%c0_14, %c0_15] : memref<16x32xf32, #tpu.memory_space<vmem>>, vector<16x32xf32>
      tpu.vector_store %arg6[%c0_14, %c0_15], %15 {strides = array<i32>} : memref<16x32xf32, #tpu.memory_space<vmem>>, vector<16x32xf32>,
    } else {
    }
    return
  }
  func.func @transform_0(%arg0: i32, %arg1: i32, %arg2: i32) -> (i32, i32) {
    %c0_i32 = arith.constant 0 : i32
    return %arg0, %arg2 : i32, i32
  }
  func.func @transform_1(%arg0: i32, %arg1: i32, %arg2: i32) -> (i32, i32) {
    %c0_i32 = arith.constant 0 : i32
    return %arg2, %arg1 : i32, i32
  }
  func.func @transform_2(%arg0: i32, %arg1: i32, %arg2: i32) -> (i32, i32) {
    %c0_i32 = arith.constant 0 : i32
    %c0_i32_0 = arith.constant 0 : i32
    return %c0_i32, %arg1 : i32, i32
  }
  func.func @transform_3(%arg0: i32, %arg1: i32, %arg2: i32) -> (i32, i32) {
    %c0_i32 = arith.constant 0 : i32
    return %arg0, %arg1 : i32, i32
  }
}

</mosaic_0001>

<bundles_post_ra>
// kernel: gpt2_attention.3
= control target key start
LH: loop header
LB: loop body
LE: loop exit
PB: predicated region body
PF: predicated region fallthrough
CT: control target
= control target key end

     0   :  { %8 = vsyncpa [#allocation4], 0  ;;  %s311_s0 = inlined_call_operand.hbm [shape: f32[16,32], index: 0, kind: input, shape index: {}]   ;;  %s312_s1 = inlined_call_operand.hbm [shape: f32[32,96], index: 1, kind: input, shape index: {}]   ;;  %s313_s2 = inlined_call_operand.vmem [shape: f32[1,96], index: 2, kind: input, shape index: {}]   ;;  %s314_s3 = inlined_call_operand.vmem [shape: f32[16,96], index: 3, kind: output, shape index: {}]  }
   0x1   :  { %9 = vsyncpa [#allocation6], 0  ;;  %s247_s12 = smov [#allocation3]   ;;  %s199_s16 = scalar_lea.hbm %s311_s0, 256 }
   0x2   :  { %s15_s13 = sshll.u32 %s247_s12, 4  ;;  %p200_p0 = scmp.ne.s32.totalorder %s311_s0, %s199_s16  ;;  %s16_s13 = int_to_ptr.vmem [resolvable:$true] %s15_s13 }
   0x3   :  { %p203_p1 = scmp.lt.u32.totalorder %s199_s16, %s311_s0 }
   0x5   :  { %p205_p2 = pnand %p203_p1, %p200_p0 }
   0x7   :  { %208 = shalt.err (!%p205_p2)
}
   0x8   :  { %s209_s21 = scalar_lea.vmem %s16_s13, 256  ;;  %p214_p4 = scmp.lt.s32.totalorder %s16_s13, %s16_s13 }
   0x9   :  { %p210_p3 = scmp.ne.s32.totalorder %s16_s13, %s209_s21  ;;  %p215_p5 = scmp.lt.s32.totalorder %s209_s21, %s209_s21 }
   0xb   :  { %p216_p6 = por %p215_p5, %p214_p4 }
   0xd   :  { %p217_p7 = pnand %p216_p6, %p210_p3 }
   0xf   :  { %220 = shalt.err (!%p217_p7)
}
  0x10   :  { %s248_s22 = smov 128   ;;  %s249_s23 = smov 8  }
  0x11   :  { %21 = dma.hbm_to_vmem [thread:$0]  %s311_s0, 256, %s16_s13, [#allocation4], %s248_s22, %s248_s22, %s249_s23  }
  0x12   :  { %s250_s26 = smov [#allocation5]   ;;  %s221_s30 = scalar_lea.hbm %s312_s1, 512 }
  0x13   :  { %s27_s27 = sshll.u32 %s250_s26, 4  ;;  %p222_p8 = scmp.ne.s32.totalorder %s312_s1, %s221_s30  ;;  %s28_s27 = int_to_ptr.vmem [resolvable:$true] %s27_s27 }
  0x14   :  { %p225_p9 = scmp.lt.u32.totalorder %s221_s30, %s312_s1 }
  0x16   :  { %p227_p10 = pnand %p225_p9, %p222_p8 }
  0x18   :  { %230 = shalt.err (!%p227_p10)
}
  0x19   :  { %s231_s8 = scalar_lea.vmem %s28_s27, 512  ;;  %p236_p12 = scmp.lt.s32.totalorder %s28_s27, %s28_s27 }
  0x1a   :  { %p232_p11 = scmp.ne.s32.totalorder %s28_s27, %s231_s8  ;;  %p237_p13 = scmp.lt.s32.totalorder %s231_s8, %s231_s8 }
  0x1c   :  { %p238_p0 = por %p237_p13, %p236_p12 }
  0x1e   :  { %p239_p1 = pnand %p238_p0, %p232_p11 }
  0x20   :  { %242 = shalt.err (!%p239_p1)
}
  0x21   :  { %33 = dma.hbm_to_vmem [thread:$0]  %s312_s1, 512, %s28_s27, [#allocation6], %s248_s22, %s248_s22, %s249_s23  }
  0x22   :  { %243 = dma.done.wait [#allocation4], 256  }
  0x23   :  { %244 = vsyncadd [#allocation4], 4294967040 }
  0x24   :  { %245 = dma.done.wait [#allocation6], 512  }
  0x25   :  { %246 = vsyncadd [#allocation6], 4294966784  ;;  %vm46_vm0 = vcmask 785408   ;;  %v251_v0 = vmov 0.0   ;;  %vm57_vm1 = vcmask 261120   ;;  %v53_v1 = vld [vmem:[#allocation5] sm:$0xff] }
  0x26   :  { %48 = vst.msk [vmem:[#allocation2 + $0x8] sm:$0xff] %vm46_vm0, %v251_v0  ;;  %47 = vst.msk [vmem:[#allocation2] sm:$0xff] %vm46_vm0, %v251_v0  ;;  %v54_v2 = vld [vmem:[#allocation5 + $0x8] sm:$0xff]  ;;  %v55_v3 = vld [vmem:[#allocation5 + $0x10] sm:$0xff] }
  0x27   :  { %v186_v4 = vpack.c.bf16 %v54_v2, %v53_v1  ;;  %v56_v5 = vld [vmem:[#allocation5 + $0x18] sm:$0xff]  ;;  %v51_v6 = vld [vmem:[#allocation3] sm:$0xff]  ;;  %v168_v15 = vld [vmem:[%s313_s2] ss:$0 sm:$0xff] }
  0x28   :  { %v190_v7 = vpack.c.bf16 %v56_v5, %v55_v3  ;;  %183 = vmatprep.mubr.msk.f32.mxu0 %vm57_vm1, %v51_v6  ;;  %v52_v8 = vld [vmem:[#allocation3 + $0x8] sm:$0xff] }
  0x29   :  { %187 = vmatprep.subr.bf16.mxu0 %v186_v4 }
  0x2a   :  { %189 = vmatpush3.bf16.msra.mxu0 %v186_v4 }
  0x2b   :  { %191 = vmatprep.subr.bf16.mxu0 %v190_v7 }
  0x2d   :  { %v50_v9 = vld [vmem:[#allocation2 + $0x8] sm:$0xff]  ;;  %v49_v10 = vld [vmem:[#allocation2] sm:$0xff] }
  0x2e   :  { %193 = vmatpush3.bf16.msra.mxu0 %v190_v7 }
  0x31   :  { %184 = vmatmul.mubr.msk.f32.vlgmr.msra.gmra.mrb[0].mxu0 %vm57_vm1, %v52_v8 }
 0x104   :  { %v185_v11 = vpop.f32.mrb[0].mxu0 }
 0x105   :  { %v140_v12 = vadd.f32 %v185_v11, %v50_v9  ;;  %v130_v13 = vpop.f32.mrb[1].mxu0 }
 0x106   :  { %v139_v14 = vadd.f32 %v130_v13, %v49_v10 }
 0x107   :  { %143 = vst.msk [vmem:[#allocation2 + $0x8] sm:$0xff] %vm46_vm0, %v140_v12 }
 0x108   :  { %142 = vst.msk [vmem:[#allocation2] sm:$0xff] %vm46_vm0, %v139_v14 }
 0x10e   :  { %v148_v16 = vld [vmem:[#allocation2 + $0x8] sm:$0xff] }
 0x10f   :  { %v157_v17 = vadd.f32 %v168_v15, %v148_v16  ;;  %v147_v18 = vld [vmem:[#allocation2] sm:$0xff] }
 0x110   :  { %v156_v19 = vadd.f32 %v168_v15, %v147_v18 }
 0x111   :  { %159 = vst.msk [vmem:[%s314_s3 + $0x8] sm:$0xff] %vm46_vm0, %v157_v17 }
 0x112   :  { %158 = vst.msk [vmem:[%s314_s3] sm:$0xff] %vm46_vm0, %v156_v19 }
 0x113   :  { %164 = vsyncpa [#allocation4], 1 }
 0x114   :  { %165 = vsyncpa [#allocation6], 1 }

// kernel: gpt2_attention.5
= control target key start
LH: loop header
LB: loop body
LE: loop exit
PB: predicated region body
PF: predicated region fallthrough
CT: control target
= control target key end

     0   :  { %vm19_vm0 = vcmask 261120   ;;  %v204_v6 = vmov 0.0   ;;  %s269_s0 = inlined_call_operand.vmem [shape: f32[16,32], index: 0, kind: input, shape index: {}]   ;;  %s270_s1 = inlined_call_operand.vmem [shape: f32[32,32], index: 1, kind: input, shape index: {}]   ;;  %s271_s2 = inlined_call_operand.vmem [shape: f32[1,32], index: 2, kind: input, shape index: {}]   ;;  %s272_s3 = inlined_call_operand.hbm [shape: f32[16,32], index: 3, kind: output, shape index: {}]  }
   0x1   :  { %v26_v0 = vld [vmem:[%s270_s1] sm:$0xff]  ;;  %v27_v1 = vld [vmem:[%s270_s1 + $0x8] sm:$0xff]  ;;  %v28_v2 = vld [vmem:[%s270_s1 + $0x10] sm:$0xff]  ;;  %21 = vst.msk [vmem:[#allocation2 + $0x8] sm:$0xff] %vm19_vm0, %v204_v6 }
   0x2   :  { %v168_v3 = vpack.c.bf16 %v27_v1, %v26_v0  ;;  %v29_v4 = vld [vmem:[%s270_s1 + $0x18] sm:$0xff]  ;;  %v24_v5 = vld [vmem:[%s269_s0] sm:$0xff]  ;;  %20 = vst.msk [vmem:[#allocation2] sm:$0xff] %vm19_vm0, %v204_v6 }
   0x3   :  { %v172_v7 = vpack.c.bf16 %v29_v4, %v28_v2  ;;  %165 = vmatprep.mubr.msk.f32.mxu0 %vm19_vm0, %v24_v5 }
   0x4   :  { %8 = vsyncpa [#allocation4], 0  ;;  %169 = vmatprep.subr.bf16.mxu0 %v168_v3  ;;  %v25_v8 = vld [vmem:[%s269_s0 + $0x8] sm:$0xff]  ;;  %v150_v15 = vld [vmem:[%s271_s2] ss:$0 sm:$0xff]  ;;  %s205_s25 = smov [#allocation3]  }
   0x5   :  { %171 = vmatpush3.bf16.msra.mxu0 %v168_v3  ;;  %s137_s26 = sshll.u32 %s205_s25, 4  ;;  %s138_s26 = int_to_ptr.vmem [resolvable:$true] %s137_s26 }
   0x6   :  { %173 = vmatprep.subr.bf16.mxu0 %v172_v7  ;;  %s180_s0 = scalar_lea.vmem %s138_s26, 256  ;;  %p185_p1 = scmp.lt.s32.totalorder %s138_s26, %s138_s26 }
   0x7   :  { %p181_p0 = scmp.ne.s32.totalorder %s138_s26, %s180_s0  ;;  %p186_p2 = scmp.lt.s32.totalorder %s180_s0, %s180_s0 }
   0x8   :  { %v23_v9 = vld [vmem:[#allocation2 + $0x8] sm:$0xff] }
   0x9   :  { %175 = vmatpush3.bf16.msra.mxu0 %v172_v7  ;;  %v22_v10 = vld [vmem:[#allocation2] sm:$0xff]  ;;  %p187_p3 = por %p186_p2, %p185_p1 }
   0xb   :  { %p188_p4 = pnand %p187_p3, %p181_p0 }
   0xc   :  { %166 = vmatmul.mubr.msk.f32.vlgmr.msra.gmra.mrb[0].mxu0 %vm19_vm0, %v25_v8 }
  0xdf   :  { %v167_v11 = vpop.f32.mrb[0].mxu0 }
  0xe0   :  { %v113_v12 = vadd.f32 %v167_v11, %v23_v9  ;;  %v103_v13 = vpop.f32.mrb[1].mxu0 }
  0xe1   :  { %v112_v14 = vadd.f32 %v103_v13, %v22_v10 }
  0xe2   :  { %115 = vst.msk [vmem:[#allocation2 + $0x8] sm:$0xff] %vm19_vm0, %v113_v12 }
  0xe3   :  { %114 = vst.msk [vmem:[#allocation2] sm:$0xff] %vm19_vm0, %v112_v14 }
  0xe9   :  { %v120_v16 = vld [vmem:[#allocation2 + $0x8] sm:$0xff] }
  0xea   :  { %v119_v17 = vld [vmem:[#allocation2] sm:$0xff]  ;;  %v129_v18 = vadd.f32 %v150_v15, %v120_v16 }
  0xeb   :  { %v128_v19 = vadd.f32 %v150_v15, %v119_v17 }
  0xec   :  { %131 = vst.msk [vmem:[#allocation3 + $0x8] sm:$0xff] %vm19_vm0, %v129_v18 }
  0xed   :  { %130 = vst.msk [vmem:[#allocation3] sm:$0xff] %vm19_vm0, %v128_v19 }
  0xee   :  { %191 = shalt.err (!%p188_p4)
}
  0xef   :  { %s192_s28 = scalar_lea.hbm %s272_s3, 256 }
  0xf0   :  { %p193_p5 = scmp.ne.s32.totalorder %s272_s3, %s192_s28  ;;  %p196_p6 = scmp.lt.u32.totalorder %s192_s28, %s272_s3 }
  0xf2   :  { %p198_p7 = pnand %p196_p6, %p193_p5 }
  0xf4   :  { %201 = shalt.err (!%p198_p7)
}
  0xf5   :  { %s206_s6 = smov 128   ;;  %s207_s7 = smov 8  }
  0xf6   :  { %143 = dma.vmem_to_hbm [thread:$0]  %s138_s26, 256, %s272_s3, [#allocation4], %s206_s6, %s206_s6, %s207_s7  }
  0xf7   :  { %202 = dma.done.wait [#allocation4], 256  }
  0xf8   :  { %203 = vsyncadd [#allocation4], 4294967040 }
  0xf9   :  { %147 = vsyncpa [#allocation4], 1 }

// kernel: gpt2_attention.4
= control target key start
LH: loop header
LB: loop body
LE: loop exit
PB: predicated region body
PF: predicated region fallthrough
CT: control target
= control target key end

     0   :  { %s3428_s12 = smov 0   ;;  %s3430_s13 = smov 0   ;;  %s3947_s0 = inlined_call_operand.vmem [shape: f32[2,8,3,4,8], index: 0, kind: input, shape index: {}, may-alias: {0,1,2}]   ;;  %s3948_s1 = inlined_call_operand.vmem [shape: f32[2,8,3,4,8], index: 1, kind: input, shape index: {}, may-alias: {0,1,2}]   ;;  %s3949_s2 = inlined_call_operand.vmem [shape: f32[2,8,3,4,8], index: 2, kind: input, shape index: {}, may-alias: {0,1,2}]   ;;  %s3950_s3 = inlined_call_operand.vmem [shape: f32[2,8,4,8], index: 3, kind: output, shape index: {}]  }
   0x1   :  { %s3432_s14 = smov 0   ;;  %s3434_s15 = smov 0  }
   0x2   :  { %s3436_s16 = smov 0  }
   0x3 LB: > { %s32_s17 = sadd.s32 1, %s3397_s15  ;;  %p48_p1 = scmp.ne.s32.totalorder %s3389_s13, %s3385_s12  ;;  %s3401_s16 = sphi %s3436_s16, %s13_s16   ;;  %s3397_s15 = sphi %s3434_s15, %s3955_s15   ;;  %s3393_s14 = sphi %s3432_s14, %s3954_s14   ;;  %s3389_s13 = sphi %s3430_s13, %s3953_s13   ;;  %s3385_s12 = sphi %s3428_s12, %s3952_s12  }
   0x4   : > { %p34_p0 = scmp.ge.s32.totalorder %s32_s17, 2  ;;  %p49_p2 = scmp.eq.s32.totalorder %s3401_s16, 0 }
   0x5   : > { %s41_s20 = sadd.s32 1, %s3389_s13  ;;  %p3179_p5 = scmp.ge.s32.totalorder %s3401_s16, 2 }
   0x6   : > { %s3957_s17 = smov (%p34_p0, %s32_s17), 0  ;;  %p3459_p3 = por %p49_p2, %p48_p1 }
   0x7   : > { %s36_s19 = ssub.s32 %s3397_s15, %s3957_s17  ;;  %158 = sbr.rel (%p3179_p5) target bundleno = 44 (0x2c), region = 16 }
   0x8   : > { %p39_p4 = scmp.eq.s32.totalorder %s36_s19, 0 }
   0xa   : > { %s3467_s21 = scalar_select %p39_p4, %s3389_s13, %s41_s20  }
   0xe   : > { %161 = sbr.rel (!%p3459_p3) target bundleno = 24 (0x18), region = 20  ;;  %s163_s22 = sand.u32 (%p3459_p3), 1, %s3389_s13  }
   0xf   : > { %s3291_s23 = smul.u32 (%p3459_p3), 96, %s3397_s15  ;;  %s3180_s24 = sshll.u32 (%p3459_p3), %s163_s22, 5 }
  0x10   : > { %s165_s28 = scalar_lea.vmem (%p3459_p3), [#allocation5], %s3180_s24 }
  0x11   : > { %s171_s27 = scalar_lea.vmem (%p3459_p3), %s3947_s0, %s3291_s23 }
  0x12   : > { %v187_v0 = vld [vmem:[%s171_s27] sm:$0xf] (%p3459_p3)  ;;  %v189_v1 = vld [vmem:[%s171_s27 + $0xc] sm:$0xf] (%p3459_p3)  ;;  %v191_v2 = vld [vmem:[%s171_s27 + $0x18] sm:$0xf] (%p3459_p3) }
  0x13   : > { %188 = vst [vmem:[%s165_s28] sm:$0xf] (%p3459_p3), %v187_v0  ;;  %190 = vst [vmem:[%s165_s28 + $0x4] sm:$0xf] (%p3459_p3), %v189_v1  ;;  %v193_v3 = vld [vmem:[%s171_s27 + $0x24] sm:$0xf] (%p3459_p3) }
  0x14   : > { %192 = vst [vmem:[%s165_s28 + $0x8] sm:$0xf] (%p3459_p3), %v191_v2  ;;  %v195_v4 = vld [vmem:[%s171_s27 + $0x30] sm:$0xf] (%p3459_p3)  ;;  %v197_v5 = vld [vmem:[%s171_s27 + $0x3c] sm:$0xf] (%p3459_p3) }
  0x15   : > { %194 = vst [vmem:[%s165_s28 + $0xc] sm:$0xf] %v193_v3  ;;  %196 = vst [vmem:[%s165_s28 + $0x10] sm:$0xf] %v195_v4  ;;  %v199_v6 = vld [vmem:[%s171_s27 + $0x48] sm:$0xf] }
  0x16   : > { %198 = vst [vmem:[%s165_s28 + $0x14] sm:$0xf] %v197_v5  ;;  %v201_v7 = vld [vmem:[%s171_s27 + $0x54] sm:$0xf]  ;;  %200 = vst [vmem:[%s165_s28 + $0x18] sm:$0xf] %v199_v6 }
  0x17   : > { %202 = vst [vmem:[%s165_s28 + $0x1c] sm:$0xf] %v201_v7 }
  0x18 PF: > { %241 = sbr.rel (!%p3459_p3) target bundleno = 34 (0x22), region = 61  ;;  %s243_s29 = sand.u32 (%p3459_p3), 1, %s3389_s13  }
  0x19   : > { %s3183_s30 = smul.u32 (%p3459_p3), 96, %s3397_s15  ;;  %s3182_s4 = sshll.u32 (%p3459_p3), %s243_s29, 5 }
  0x1a   : > { %s245_s8 = scalar_lea.vmem (%p3459_p3), [#allocation6], %s3182_s4 }
  0x1b   : > { %s3082_s7 = scalar_lea.vmem (%p3459_p3), %s3948_s1, %s3183_s30 }
  0x1c   : > { %v3184_v8 = vld [vmem:[%s3082_s7 + $0x4] sm:$0xf] (%p3459_p3)  ;;  %v3185_v9 = vld [vmem:[%s3082_s7 + $0x10] sm:$0xf] (%p3459_p3)  ;;  %v3186_v10 = vld [vmem:[%s3082_s7 + $0x1c] sm:$0xf] (%p3459_p3) }
  0x1d   : > { %269 = vst [vmem:[%s245_s8] sm:$0xf] (%p3459_p3), %v3184_v8  ;;  %271 = vst [vmem:[%s245_s8 + $0x4] sm:$0xf] (%p3459_p3), %v3185_v9  ;;  %v3187_v11 = vld [vmem:[%s3082_s7 + $0x28] sm:$0xf] (%p3459_p3) }
  0x1e   : > { %273 = vst [vmem:[%s245_s8 + $0x8] sm:$0xf] (%p3459_p3), %v3186_v10  ;;  %v3188_v12 = vld [vmem:[%s3082_s7 + $0x34] sm:$0xf] (%p3459_p3)  ;;  %v3189_v13 = vld [vmem:[%s3082_s7 + $0x40] sm:$0xf] (%p3459_p3) }
  0x1f   : > { %275 = vst [vmem:[%s245_s8 + $0xc] sm:$0xf] %v3187_v11  ;;  %277 = vst [vmem:[%s245_s8 + $0x10] sm:$0xf] %v3188_v12  ;;  %v3190_v14 = vld [vmem:[%s3082_s7 + $0x4c] sm:$0xf] }
  0x20   : > { %279 = vst [vmem:[%s245_s8 + $0x14] sm:$0xf] %v3189_v13  ;;  %v3191_v15 = vld [vmem:[%s3082_s7 + $0x58] sm:$0xf]  ;;  %281 = vst [vmem:[%s245_s8 + $0x18] sm:$0xf] %v3190_v14 }
  0x21   : > { %283 = vst [vmem:[%s245_s8 + $0x1c] sm:$0xf] %v3191_v15 }
  0x22 PF: > { %322 = sbr.rel (!%p3459_p3) target bundleno = 44 (0x2c), region = 102  ;;  %s324_s9 = sand.u32 (%p3459_p3), 1, %s3389_s13  }
  0x23   : > { %s3193_s10 = smul.u32 (%p3459_p3), 96, %s3397_s15  ;;  %s3192_s11 = sshll.u32 (%p3459_p3), %s324_s9, 5 }
  0x24   : > { %s326_s23 = scalar_lea.vmem (%p3459_p3), [#allocation7], %s3192_s11 }
  0x25   : > { %s3090_s22 = scalar_lea.vmem (%p3459_p3), %s3949_s2, %s3193_s10 }
  0x26   : > { %v3194_v16 = vld [vmem:[%s3090_s22 + $0x8] sm:$0xf] (%p3459_p3)  ;;  %v3195_v17 = vld [vmem:[%s3090_s22 + $0x14] sm:$0xf] (%p3459_p3)  ;;  %v3196_v18 = vld [vmem:[%s3090_s22 + $0x20] sm:$0xf] (%p3459_p3) }
  0x27   : > { %350 = vst [vmem:[%s326_s23] sm:$0xf] (%p3459_p3), %v3194_v16  ;;  %352 = vst [vmem:[%s326_s23 + $0x4] sm:$0xf] (%p3459_p3), %v3195_v17  ;;  %v3197_v19 = vld [vmem:[%s3090_s22 + $0x2c] sm:$0xf] (%p3459_p3) }
  0x28   : > { %354 = vst [vmem:[%s326_s23 + $0x8] sm:$0xf] (%p3459_p3), %v3196_v18  ;;  %v3198_v20 = vld [vmem:[%s3090_s22 + $0x38] sm:$0xf] (%p3459_p3)  ;;  %v3199_v21 = vld [vmem:[%s3090_s22 + $0x44] sm:$0xf] (%p3459_p3) }
  0x29   : > { %356 = vst [vmem:[%s326_s23 + $0xc] sm:$0xf] %v3197_v19  ;;  %358 = vst [vmem:[%s326_s23 + $0x10] sm:$0xf] %v3198_v20  ;;  %v3200_v22 = vld [vmem:[%s3090_s22 + $0x50] sm:$0xf] }
  0x2a   : > { %360 = vst [vmem:[%s326_s23 + $0x14] sm:$0xf] %v3199_v21  ;;  %v3201_v23 = vld [vmem:[%s3090_s22 + $0x5c] sm:$0xf]  ;;  %362 = vst [vmem:[%s326_s23 + $0x18] sm:$0xf] %v3200_v22 }
  0x2b   : > { %364 = vst [vmem:[%s326_s23 + $0x1c] sm:$0xf] %v3201_v23 }
  0x2c PF: > { %p3202_p6 = scmp.ge.s32.totalorder %s3401_s16, 1  ;;  %p402_p7 = scmp.lt.s32.totalorder %s3401_s16, 3 }
  0x2e   : > { %p403_p8 = pnand %p3202_p6, %p402_p7 }
  0x2f   : > { %s409_s18 = sand.u32 (!%p403_p8), 1, %s3385_s12   ;;  %vm486_vm0 = vcmask (!%p403_p8), 64512   ;;  %v3403_v24 = vmov (!%p403_p8), 0.0   ;;  %vm1652_vm1 = vcmask (!%p403_p8), 1041409   ;;  %vm1655_vm2 = vcmask (!%p403_p8), 1042434   ;;  %p462_p9 = scmp.lt.s32.totalorder (!%p403_p8), %s3393_s14, 1 }
  0x30   : > { %406 = sbr.rel (%p403_p8) target bundleno = 1389 (0x56d), region = 143  ;;  %3251 = vmatprep.subr.mxu0 (!%p403_p8), %v3403_v24  ;;  %s3495_s24 = sshll.u32 (!%p403_p8), %s409_s18, 5  ;;  %487 = vst.msk [vmem:[#allocation4] sm:$0xff] (!%p403_p8), %vm486_vm0, %v3403_v24  ;;  %488 = vst.msk [vmem:[#allocation4 + $0x8] sm:$0xff] (!%p403_p8), %vm486_vm0, %v3403_v24  ;;  %3256 = vmatprep.subr.mxu1 (!%p403_p8), %v3403_v24  ;;  %vm1658_vm3 = vcmask (!%p403_p8), 1043459   ;;  %vm1661_vm4 = vcmask (!%p403_p8), 1044484   ;;  %v1610_v6 = vlaneseq (!%p403_p8) }
  0x31   : > { %489 = vst.msk [vmem:[#allocation4 + $0x10] sm:$0xff] (!%p403_p8), %vm486_vm0, %v3403_v24  ;;  %490 = vst.msk [vmem:[#allocation4 + $0x18] sm:$0xff] (!%p403_p8), %vm486_vm0, %v3403_v24  ;;  %s3507_s12 = scalar_lea.vmem (!%p403_p8), [#allocation6], %s3495_s24  ;;  %vm3404_vm5 = vmmov (!%p403_p8), 0   ;;  %vm1664_vm6 = vcmask (!%p403_p8), 1045509   ;;  %vm1667_vm7 = vcmask (!%p403_p8), 1046534  }
  0x32   : > { %v1627_v25 = vld [vmem:[%s3507_s12] sm:$0x1] (!%p403_p8)  ;;  %v1628_v26 = vld [vmem:[%s3507_s12 + $0x4] sm:$0x1] (!%p403_p8)  ;;  %v1629_v27 = vld [vmem:[%s3507_s12 + $0x8] sm:$0x1] (!%p403_p8)  ;;  %3253 = vmatprep.mubr.msk.f32.mxu0 (!%p403_p8), %vm3404_vm5, %v3403_v24  ;;  %3258 = vmatprep.mubr.msk.f32.mxu1 (!%p403_p8), %vm3404_vm5, %v3403_v24 }
  0x33   : > { %v1630_v28 = vld [vmem:[%s3507_s12 + $0xc] sm:$0x1] (!%p403_p8)  ;;  %v1631_v29 = vld [vmem:[%s3507_s12 + $0x10] sm:$0x1] (!%p403_p8)  ;;  %v1632_v30 = vld [vmem:[%s3507_s12 + $0x14] sm:$0x1] (!%p403_p8) }
  0x34   : > { %v1633_v31 = vld [vmem:[%s3507_s12 + $0x18] sm:$0x1] (!%p403_p8)  ;;  %v1680_v32 = vrot.slane (!%p403_p8), %v1628_v26, 7  ;;  %v1682_v33 = vrot.slane (!%p403_p8), %v1629_v27, 6  ;;  %v1634_v34 = vld [vmem:[%s3507_s12 + $0x1c] sm:$0x1] (!%p403_p8) }
  0x35   : > { %v1684_v35 = vrot.slane (!%p403_p8), %v1630_v28, 5  ;;  %v1686_v36 = vrot.slane (!%p403_p8), %v1631_v29, 4  ;;  %v1688_v37 = vrot.slane (!%p403_p8), %v1632_v30, 3  ;;  %v1690_v38 = vrot.slane (!%p403_p8), %v1633_v31, 2  ;;  %s3523_s25 = scalar_lea.vmem (!%p403_p8), [#allocation5], %s3495_s24  ;;  %s3582_s26 = scalar_lea.vmem (!%p403_p8), [#allocation7], %s3495_s24 }
  0x36   : > { %v1681_v39 = vsel (!%p403_p8), %vm1652_vm1, %v1680_v32, %v1627_v25  ;;  %v1619_v40 = vld [vmem:[%s3523_s25] sm:$0x1] (!%p403_p8)  ;;  %v1620_v41 = vld [vmem:[%s3523_s25 + $0x4] sm:$0x1] (!%p403_p8)  ;;  %v1621_v42 = vld [vmem:[%s3523_s25 + $0x8] sm:$0x1] (!%p403_p8) }
  0x37   : > { %v1683_v43 = vsel %vm1655_vm2, %v1682_v33, %v1681_v39  ;;  %v1622_v44 = vld [vmem:[%s3523_s25 + $0xc] sm:$0x1]  ;;  %v1623_v45 = vld [vmem:[%s3523_s25 + $0x10] sm:$0x1]  ;;  %v1624_v46 = vld [vmem:[%s3523_s25 + $0x14] sm:$0x1] }
  0x38   : > { %v1685_v47 = vsel %vm1658_vm3, %v1684_v35, %v1683_v43  ;;  %v1692_v48 = vrot.slane %v1634_v34, 1  ;;  %v1625_v49 = vld [vmem:[%s3523_s25 + $0x18] sm:$0x1]  ;;  %v1651_v50 = vrot.slane %v1620_v41, 7  ;;  %v1654_v51 = vrot.slane %v1621_v42, 6  ;;  %s3959_s14 = smov (!%p462_p9, %s3393_s14), 1 }
  0x39   : > { %vm1670_vm8 = vcmask 1047559   ;;  %v1687_v52 = vsel %vm1661_vm4, %v1686_v36, %v1685_v47  ;;  %v1626_v53 = vld [vmem:[%s3523_s25 + $0x1c] sm:$0x1]  ;;  %v1657_v54 = vrot.slane %v1622_v44, 5  ;;  %v1660_v55 = vrot.slane %v1623_v45, 4  ;;  %s3234_s27 = sshll.u32 %s3959_s14, 5 }
  0x3a   : > { %v1689_v56 = vsel %vm1664_vm6, %v1688_v37, %v1687_v52  ;;  %v1653_v57 = vsel %vm1652_vm1, %v1651_v50, %v1619_v40  ;;  %v1663_v58 = vrot.slane %v1624_v46, 3  ;;  %v1666_v61 = vrot.slane %v1625_v49, 2  ;;  %v1636_v18 = vld [vmem:[%s3582_s26 + $0x4] sm:$0x1]  ;;  %v1637_v20 = vld [vmem:[%s3582_s26 + $0x8] sm:$0x1]  ;;  %s3840_s30 = scalar_lea.vmem %s3950_s3, %s3234_s27 }
  0x3b   : > { %v1691_v59 = vsel %vm1667_vm7, %v1690_v38, %v1689_v56  ;;  %v1656_v60 = vsel %vm1655_vm2, %v1654_v51, %v1653_v57  ;;  %v1669_v0 = vrot.slane %v1626_v53, 1  ;;  %vm477_vm9 = vcmask 7168   ;;  %v1635_v22 = vld [vmem:[%s3582_s26] sm:$0x1]  ;;  %v1638_v23 = vld [vmem:[%s3582_s26 + $0xc] sm:$0x1] }
  0x3c   : > { %v1693_v62 = vsel %vm1670_vm8, %v1692_v48, %v1691_v59  ;;  %v1659_v63 = vsel %vm1658_vm3, %v1657_v54, %v1656_v60  ;;  %v3405_v5 = vmov -inf   ;;  %482 = vst.msk [vmem:[#allocation3] sm:$0xff] %vm477_vm9, %v3403_v24  ;;  %483 = vst.msk [vmem:[#allocation3 + $0x8] sm:$0xff] %vm477_vm9, %v3403_v24  ;;  %v3563_v7 = vshrl.u32 %v1610_v6, 7  ;;  %v1639_v26 = vld [vmem:[%s3582_s26 + $0x10] sm:$0x1] }
  0x3d   : > { %3252 = vmatpush3.xpose.msk.msra.mxu0 %vm486_vm0, %v1693_v62  ;;  %v1662_v1 = vsel %vm1661_vm4, %v1660_v55, %v1659_v63  ;;  %478 = vst.msk [vmem:[#allocation2] sm:$0xff] %vm477_vm9, %v3405_v5  ;;  %479 = vst.msk [vmem:[#allocation2 + $0x8] sm:$0xff] %vm477_vm9, %v3405_v5  ;;  %v3565_v8 = vand.u32 127, %v1610_v6  ;;  %v3406_v14 = vmov 0   ;;  %v1810_v21 = vrot.slane %v1636_v18, 7 }
  0x3e   : > { %v1665_v2 = vsel %vm1664_vm6, %v1663_v58, %v1662_v1  ;;  %3266 = vmatprep.subr.mxu0 %v3403_v24  ;;  %480 = vst.msk [vmem:[#allocation2 + $0x10] sm:$0xff] %vm477_vm9, %v3405_v5  ;;  %481 = vst.msk [vmem:[#allocation2 + $0x18] sm:$0xff] %vm477_vm9, %v3405_v5  ;;  %3337 = vset.pattern.permute.xlu0 %v3406_v14  ;;  %v1812_v25 = vrot.slane %v1637_v20, 6  ;;  %v1814_v28 = vrot.slane %v1638_v23, 5  ;;  %v1640_v29 = vld [vmem:[%s3582_s26 + $0x14] sm:$0x1] }
  0x3f   : > { %v1668_v3 = vsel %vm1667_vm7, %v1666_v61, %v1665_v2  ;;  %484 = vst.msk [vmem:[#allocation3 + $0x10] sm:$0xff] %vm477_vm9, %v3403_v24  ;;  %485 = vst.msk [vmem:[#allocation3 + $0x18] sm:$0xff] %vm477_vm9, %v3403_v24  ;;  %vm1618_vm10 = vcmp.le.s32.totalorder %v3565_v8, %v3563_v7  ;;  %3338 = vset.pattern.permute.xlu1 %v3406_v14  ;;  %v1811_v27 = vsel %vm1652_vm1, %v1810_v21, %v1635_v22  ;;  %v1641_v32 = vld [vmem:[%s3582_s26 + $0x18] sm:$0x1]  ;;  %v1642_v33 = vld [vmem:[%s3582_s26 + $0x1c] sm:$0x1] }
  0x40   : > { %v1671_v4 = vsel %vm1670_vm8, %v1669_v0, %v1668_v3  ;;  %v1813_v30 = vsel %vm1655_vm2, %v1812_v25, %v1811_v27  ;;  %v1816_v31 = vrot.slane %v1639_v26, 4  ;;  %v1818_v35 = vrot.slane %v1640_v29, 3  ;;  %v1910_v42 = vld [vmem:[%s3507_s12 + $0x5] sm:$0x1]  ;;  %v1911_v43 = vld [vmem:[%s3507_s12 + $0x9] sm:$0x1] }
  0x41   : > { %3254 = vmatmul.mubr.msk.f32.vlgmr.msra.gmra.mrb[0].mxu0 %vm486_vm0, %v1671_v4  ;;  %v1815_v34 = vsel %vm1658_vm3, %v1814_v28, %v1813_v30  ;;  %v1820_v37 = vrot.slane %v1641_v32, 2  ;;  %v1822_v38 = vrot.slane %v1642_v33, 1  ;;  %v1955_v44 = vrot.slane %v1910_v42, 7  ;;  %v1909_v45 = vld [vmem:[%s3507_s12 + $0x1] sm:$0x1] }
  0x42   : > { %3268 = vmatprep.mubr.msk.f32.mxu0 %vm3404_vm5, %v3403_v24  ;;  %v1817_v36 = vsel %vm1661_vm4, %v1816_v31, %v1815_v34  ;;  %v1902_v46 = vld [vmem:[%s3523_s25 + $0x5] sm:$0x1]  ;;  %v2186_v47 = vld [vmem:[%s3507_s12 + $0x6] sm:$0x1]  ;;  %v1912_v48 = vld [vmem:[%s3507_s12 + $0xd] sm:$0x1] }
  0x43   : > { %v1819_v39 = vsel %vm1664_vm6, %v1818_v35, %v1817_v36  ;;  %v1957_v49 = vrot.slane %v1911_v43, 6  ;;  %v1956_v50 = vsel %vm1652_vm1, %v1955_v44, %v1909_v45  ;;  %v1903_v51 = vld [vmem:[%s3523_s25 + $0x9] sm:$0x1]  ;;  %v1933_v52 = vrot.slane %v1902_v46, 7  ;;  %v2187_v53 = vld [vmem:[%s3507_s12 + $0xa] sm:$0x1] }
  0x44   : > { %v3576_v15 = vld [vmem:[#allocation2] sm:$0xff]  ;;  %v1821_v40 = vsel %vm1667_vm7, %v1820_v37, %v1819_v39  ;;  %v2231_v54 = vrot.slane %v2186_v47, 7  ;;  %v1913_v58 = vld [vmem:[%s3507_s12 + $0x11] sm:$0x1]  ;;  %v1959_v59 = vrot.slane %v1912_v48, 5  ;;  %v1935_v63 = vrot.slane %v1903_v51, 6 }
  0x45   : > { %v1823_v41 = vsel %vm1670_vm8, %v1822_v38, %v1821_v40  ;;  %v1901_v55 = vld [vmem:[%s3523_s25 + $0x1] sm:$0x1]  ;;  %v2185_v56 = vld [vmem:[%s3507_s12 + $0x2] sm:$0x1]  ;;  %v2178_v57 = vld [vmem:[%s3523_s25 + $0x6] sm:$0x1]  ;;  %v1958_v61 = vsel %vm1655_vm2, %v1957_v49, %v1956_v50 }
  0x46   : > { %3257 = vmatpush3.msra.mxu1 %v1823_v41  ;;  %v2462_v60 = vld [vmem:[%s3507_s12 + $0x7] sm:$0x1]  ;;  %v1904_v62 = vld [vmem:[%s3523_s25 + $0xd] sm:$0x1]  ;;  %v2188_v0 = vld [vmem:[%s3507_s12 + $0xe] sm:$0x1]  ;;  %v1934_v4 = vsel %vm1652_vm1, %v1933_v52, %v1901_v55  ;;  %v2232_v5 = vsel %vm1652_vm1, %v2231_v54, %v2185_v56  ;;  %v1960_v21 = vsel %vm1658_vm3, %v1959_v59, %v1958_v61 }
  0x47   : > { %3261 = vmatprep.subr.mxu1 %v3403_v24  ;;  %v2233_v1 = vrot.slane %v2187_v53, 6  ;;  %v1914_v2 = vld [vmem:[%s3507_s12 + $0x15] sm:$0x1]  ;;  %v1905_v3 = vld [vmem:[%s3523_s25 + $0x11] sm:$0x1]  ;;  %v1937_v22 = vrot.slane %v1904_v62, 5  ;;  %v1936_v27 = vsel %vm1655_vm2, %v1935_v63, %v1934_v4 }
  0x48   : > { %v2177_v6 = vld [vmem:[%s3523_s25 + $0x2] sm:$0x1]  ;;  %v2463_v14 = vld [vmem:[%s3507_s12 + $0xb] sm:$0x1]  ;;  %v2454_v18 = vld [vmem:[%s3523_s25 + $0x7] sm:$0x1] }
  0x49   : > { %v2189_v23 = vld [vmem:[%s3507_s12 + $0x12] sm:$0x1]  ;;  %v2461_v25 = vld [vmem:[%s3507_s12 + $0x3] sm:$0x1]  ;;  %v1915_v26 = vld [vmem:[%s3507_s12 + $0x19] sm:$0x1]  ;;  %v2234_v28 = vsel %vm1655_vm2, %v2233_v1, %v2232_v5  ;;  %v1938_v43 = vsel %vm1658_vm3, %v1937_v22, %v1936_v27 }
  0x4a   : > { %v2235_v29 = vrot.slane %v2188_v0, 5  ;;  %v2180_v30 = vld [vmem:[%s3523_s25 + $0xe] sm:$0x1]  ;;  %v2464_v32 = vld [vmem:[%s3507_s12 + $0xf] sm:$0x1]  ;;  %v2509_v34 = vrot.slane %v2463_v14, 6 }
  0x4b   : > { %v2455_v35 = vld [vmem:[%s3523_s25 + $0xb] sm:$0x1]  ;;  %v2485_v36 = vrot.slane %v2454_v18, 7  ;;  %v1963_v38 = vrot.slane %v1914_v2, 3  ;;  %v1906_v39 = vld [vmem:[%s3523_s25 + $0x15] sm:$0x1] }
  0x4c   : > { %v1939_v40 = vrot.slane %v1905_v3, 4  ;;  %v2453_v42 = vld [vmem:[%s3523_s25 + $0x3] sm:$0x1]  ;;  %v2190_v44 = vld [vmem:[%s3507_s12 + $0x16] sm:$0x1]  ;;  %v2237_v45 = vrot.slane %v2189_v23, 4  ;;  %v2236_v48 = vsel %vm1658_vm3, %v2235_v29, %v2234_v28 }
  0x4d   : > { %v2181_v46 = vld [vmem:[%s3523_s25 + $0x12] sm:$0x1]  ;;  %v2213_v47 = vrot.slane %v2180_v30, 5  ;;  %v2465_v50 = vld [vmem:[%s3507_s12 + $0x13] sm:$0x1]  ;;  %v2511_v51 = vrot.slane %v2464_v32, 5  ;;  %v2486_v59 = vsel %vm1652_vm1, %v2485_v36, %v2453_v42 }
  0x4e   : > { %v2456_v52 = vld [vmem:[%s3523_s25 + $0xf] sm:$0x1]  ;;  %v2487_v53 = vrot.slane %v2455_v35, 6  ;;  %v1916_v54 = vld [vmem:[%s3507_s12 + $0x1d] sm:$0x1]  ;;  %v1965_v55 = vrot.slane %v1915_v26, 2  ;;  %v1940_v61 = vsel %vm1661_vm4, %v1939_v40, %v1938_v43  ;;  %v2238_v2 = vsel %vm1661_vm4, %v2237_v45, %v2236_v48 }
  0x4f   : > { %v1907_v56 = vld [vmem:[%s3523_s25 + $0x19] sm:$0x1]  ;;  %v2191_v62 = vld [vmem:[%s3507_s12 + $0x1a] sm:$0x1]  ;;  %v2239_v63 = vrot.slane %v2190_v44, 3  ;;  %v2215_v1 = vrot.slane %v2181_v46, 4 }
  0x50   : > { %v2182_v0 = vld [vmem:[%s3523_s25 + $0x16] sm:$0x1]  ;;  %v2466_v4 = vld [vmem:[%s3507_s12 + $0x17] sm:$0x1]  ;;  %v2513_v5 = vrot.slane %v2465_v50, 4  ;;  %v2241_v22 = vrot.slane %v2191_v62, 2 }
  0x51   : > { %v2183_v23 = vld [vmem:[%s3523_s25 + $0x1a] sm:$0x1]  ;;  %v2240_v26 = vsel %vm1664_vm6, %v2239_v63, %v2238_v2  ;;  %v2467_v28 = vld [vmem:[%s3507_s12 + $0x1b] sm:$0x1]  ;;  %v2515_v29 = vrot.slane %v2466_v4, 3  ;;  %vm2799_vm11 = vcmask 57344  }
  0x52   : > { %v2458_v30 = vld [vmem:[%s3523_s25 + $0x17] sm:$0x1]  ;;  %v2242_v40 = vsel %vm1667_vm7, %v2241_v22, %v2240_v26  ;;  %v2468_v42 = vld [vmem:[%s3507_s12 + $0x1f] sm:$0x1]  ;;  %v2517_v43 = vrot.slane %v2467_v28, 2 }
  0x53   : > { %v2459_v44 = vld [vmem:[%s3523_s25 + $0x1b] sm:$0x1]  ;;  %v2493_v45 = vrot.slane %v2458_v30, 3  ;;  %v1918_v28 = vld [vmem:[%s3582_s26 + $0x5] sm:$0x1] }
  0x54   : > { %v3738_v8 = vld [vmem:[#allocation2 + $0x18] sm:$0xff]  ;;  %v1919_v30 = vld [vmem:[%s3582_s26 + $0x9] sm:$0x1] }
 0x114   : > { %v1765_v9 = vpop.f32.mrb[0].mxu0 }
 0x115   : > { %v1769_v10 = vmul.f32 0.35355338, %v1765_v9  ;;  %v3255_v11 = vpop.f32.mrb[1].mxu0  ;;  %v2179_v9 = vld [vmem:[%s3523_s25 + $0xa] sm:$0x1] }
 0x116   : > { %v2211_v31 = vrot.slane %v2179_v9, 6  ;;  %v2489_v9 = vrot.slane %v2456_v52, 5  ;;  %v2519_v52 = vrot.slane %v2468_v42, 1  ;;  %v1923_v42 = vld [vmem:[%s3582_s26 + $0x19] sm:$0x1] }
 0x117   : > { %v3572_v12 = vsel %vm1618_vm10, %v1769_v10, -10000.0  ;;  %v2209_v10 = vrot.slane %v2178_v57, 7  ;;  %v1941_v57 = vrot.slane %v1906_v39, 3 }
 0x118   : > { %v1772_v13 = vsel %vm486_vm0, %v3572_v12, -inf }
 0x119   : > { %1773 = vmax.xlane.f32.xlu0 %v1772_v13  ;;  %v1961_v13 = vrot.slane %v1913_v58, 4 }
 0x11b   : > { %v1962_v37 = vsel %vm1661_vm4, %v1961_v13, %v1960_v21  ;;  %v1943_v13 = vrot.slane %v1907_v56, 2  ;;  %v2192_v21 = vld [vmem:[%s3507_s12 + $0x1e] sm:$0x1] }
 0x11c   : > { %v2243_v36 = vrot.slane %v2192_v21, 1  ;;  %v2046_v21 = vld [vmem:[#allocation2 + $0x8] sm:$0xff] }
 0x11e   : > { %v2244_v50 = vsel %vm1670_vm8, %v2243_v36, %v2242_v40  ;;  %v2088_v36 = vrot.slane %v1919_v30, 6  ;;  %v1922_v40 = vld [vmem:[%s3582_s26 + $0x15] sm:$0x1] }
 0x1a6   : > { %v1774_v16 = vpop.xlane.xlu0 %1773 }
 0x1a7   : > { %v3579_v17 = vmax.f32 %v3576_v15, %v1774_v16  ;;  %v2507_v16 = vrot.slane %v2462_v60, 7  ;;  %v1964_v60 = vsel %vm1664_vm6, %v1963_v38, %v1962_v37  ;;  %v2184_v37 = vld [vmem:[%s3523_s25 + $0x1e] sm:$0x1]  ;;  %v2219_v38 = vrot.slane %v2183_v23, 2 }
 0x1a8   : > { %v1966_v18 = vsel %vm1667_vm7, %v1965_v55, %v1964_v60 }
 0x1a9   : > { %v1776_v19 = vsub.f32 %v3576_v15, %v3579_v17  ;;  %1900 = vst.msk [vmem:[#allocation2] sm:$0xff] %vm477_vm9, %v3579_v17  ;;  %1781 = vperm.xlu0 %3337, %v3579_v17   ;;  %v2508_v41 = vsel %vm1652_vm1, %v2507_v16, %v2461_v25  ;;  %v2488_v16 = vsel %vm1655_vm2, %v2487_v53, %v2486_v59  ;;  %v2217_v25 = vrot.slane %v2182_v0, 3  ;;  %v2460_v53 = vld [vmem:[%s3523_s25 + $0x1f] sm:$0x1]  ;;  %v2063_v17 = vld [vmem:[#allocation3 + $0x8] sm:$0xff] }
 0x1aa   : > { %v2510_v58 = vsel %vm1655_vm2, %v2509_v34, %v2508_v41 }
 0x1ab   : > { %v2512_v14 = vsel %vm1658_vm3, %v2511_v51, %v2510_v58  ;;  %v2497_v58 = vrot.slane %v2460_v53, 1 }
 0x228   : > { %v1782_v11 = vpop.permute.xlu0 %1781 }
 0x229   : > { %v1784_v20 = vsub.f32 %v3572_v12, %v1782_v11  ;;  %v2210_v12 = vsel %vm1652_vm1, %v2209_v10, %v2177_v6  ;;  %v2457_v6 = vld [vmem:[%s3523_s25 + $0x13] sm:$0x1]  ;;  %v1967_v10 = vrot.slane %v1916_v54, 1  ;;  %v1908_v11 = vld [vmem:[%s3523_s25 + $0x1d] sm:$0x1]  ;;  %v2495_v54 = vrot.slane %v2459_v44, 2 }
 0x22a   : > { %v2212_v49 = vsel %vm1655_vm2, %v2211_v31, %v2210_v12  ;;  %v2491_v31 = vrot.slane %v2457_v6, 4  ;;  %v1945_v32 = vrot.slane %v1908_v11, 1  ;;  %v2490_v12 = vsel %vm1658_vm3, %v2489_v9, %v2488_v16 }
 0x22b   : > { %v1785_v33 = vmul.f32 1.442695, %v1784_v20  ;;  %v2214_v3 = vsel %vm1658_vm3, %v2213_v47, %v2212_v49  ;;  %v1942_v20 = vsel %vm1664_vm6, %v1941_v57, %v1940_v61  ;;  %v1968_v34 = vsel %vm1670_vm8, %v1967_v10, %v1966_v18 }
 0x22c   : > { %v2216_v27 = vsel %vm1661_vm4, %v2215_v1, %v2214_v3  ;;  %v1944_v35 = vsel %vm1667_vm7, %v1943_v13, %v1942_v20  ;;  %v2492_v47 = vsel %vm1661_vm4, %v2491_v31, %v2490_v12  ;;  %v2221_v49 = vrot.slane %v2184_v37, 1  ;;  %v1920_v12 = vld [vmem:[%s3582_s26 + $0xd] sm:$0x1] }
 0x22d   : > { %3339 = vpow2.f32 %v1785_v33  ;;  %v2514_v33 = vsel %vm1661_vm4, %v2513_v5, %v2512_v14  ;;  %v2218_v41 = vsel %vm1664_vm6, %v2217_v25, %v2216_v27  ;;  %v1946_v48 = vsel %vm1670_vm8, %v1945_v32, %v1944_v35  ;;  %v2322_v25 = vld [vmem:[#allocation2 + $0x10] sm:$0xff] }
 0x22e   : > { %v2516_v46 = vsel %vm1664_vm6, %v2515_v29, %v2514_v33  ;;  %v2220_v51 = vsel %vm1667_vm7, %v2219_v38, %v2218_v41  ;;  %v2494_v56 = vsel %vm1664_vm6, %v2493_v45, %v2492_v47  ;;  %v2086_v31 = vrot.slane %v1918_v28, 7  ;;  %v1917_v33 = vld [vmem:[%s3582_s26 + $0x1] sm:$0x1]  ;;  %v1924_v45 = vld [vmem:[%s3582_s26 + $0x1d] sm:$0x1] }
 0x22f   : > { %v2518_v55 = vsel %vm1667_vm7, %v2517_v43, %v2516_v46  ;;  %v2222_v57 = vsel %vm1670_vm8, %v2221_v49, %v2220_v51  ;;  %v2496_v60 = vsel %vm1667_vm7, %v2495_v54, %v2494_v56  ;;  %v2090_v37 = vrot.slane %v1920_v12, 5  ;;  %v2473_v28 = vld [vmem:[%s3582_s26 + $0x13] sm:$0x1]  ;;  %v2199_v12 = vld [vmem:[%s3582_s26 + $0x1a] sm:$0x1] }
 0x230   : > { %v2520_v59 = vsel %vm1670_vm8, %v2519_v52, %v2518_v55  ;;  %v2498_v61 = vsel %vm1670_vm8, %v2497_v58, %v2496_v60  ;;  %v2087_v35 = vsel %vm1652_vm1, %v2086_v31, %v1917_v33  ;;  %v2094_v44 = vrot.slane %v1922_v40, 3  ;;  %v2195_v60 = vld [vmem:[%s3582_s26 + $0xa] sm:$0x1] }
 0x231   : > { %v2089_v43 = vsel %vm1655_vm2, %v2088_v36, %v2087_v35  ;;  %v2096_v47 = vrot.slane %v1923_v42, 2  ;;  %v2098_v49 = vrot.slane %v1924_v45, 1  ;;  %v2200_v42 = vld [vmem:[%s3582_s26 + $0x1e] sm:$0x1] }
 0x232   : > { %v2091_v46 = vsel %vm1658_vm3, %v2090_v37, %v2089_v43  ;;  %v2644_v37 = vrot.slane %v2473_v28, 4  ;;  %v2372_v43 = vrot.slane %v2199_v12, 2 }
 0x237   : > { %v3680_v39 = vpop.eup %3339 }
 0x238   : > { %3259 = vmatmul.mubr.msk.f32.vlgmr.msra.gmra.mrb[0].mxu1 %vm486_vm0, %v3680_v39  ;;  %v1789_v54 = vsel %vm486_vm0, %v3680_v39, 0.0  ;;  %v2194_v39 = vld [vmem:[%s3582_s26 + $0x6] sm:$0x1] }
 0x239   : > { %3262 = vmatpush3.xpose.msk.msra.mxu1 %vm486_vm0, %v1968_v34  ;;  %3263 = vmatprep.mubr.msk.f32.mxu1 %vm3404_vm5, %v3403_v24  ;;  %v1921_v34 = vld [vmem:[%s3582_s26 + $0x11] sm:$0x1] }
 0x23a   : > { %3271 = vmatprep.subr.mxu1 %v3403_v24  ;;  %v2092_v41 = vrot.slane %v1921_v34, 4 }
 0x23c   : > { %3264 = vmatmul.mubr.msk.f32.vlgmr.msra.gmra.mrb[2].mxu1 %vm486_vm0, %v1946_v48  ;;  %v2093_v48 = vsel %vm1661_vm4, %v2092_v41, %v2091_v46  ;;  %v2475_v46 = vld [vmem:[%s3582_s26 + $0x1b] sm:$0x1] }
 0x23d   : > { %3272 = vmatpush3.xpose.msk.msra.mxu1 %vm486_vm0, %v2244_v50  ;;  %3273 = vmatprep.mubr.msk.f32.mxu1 %vm3404_vm5, %v3403_v24  ;;  %v2095_v50 = vsel %vm1664_vm6, %v2094_v44, %v2093_v48 }
 0x23e   : > { %3281 = vmatprep.subr.mxu1 %v3403_v24  ;;  %v2097_v51 = vsel %vm1667_vm7, %v2096_v47, %v2095_v50 }
 0x23f   : > { %v2099_v52 = vsel %vm1670_vm8, %v2098_v49, %v2097_v51  ;;  %v2374_v49 = vrot.slane %v2200_v42, 1 }
 0x240   : > { %3274 = vmatmul.mubr.msk.f32.vlgmr.msra.gmra.mrb[4].mxu1 %vm486_vm0, %v2222_v57  ;;  %3267 = vmatpush3.msra.mxu0 %v2099_v52  ;;  %v2476_v52 = vld [vmem:[%s3582_s26 + $0x1f] sm:$0x1] }
 0x241   : > { %3282 = vmatpush3.xpose.msk.msra.mxu1 %vm486_vm0, %v2520_v59  ;;  %3283 = vmatprep.mubr.msk.f32.mxu1 %vm3404_vm5, %v3403_v24 }
 0x242   : > { %3276 = vmatprep.subr.mxu0 %v3403_v24 }
 0x244   : > { %3284 = vmatmul.mubr.msk.f32.vlgmr.msra.gmra.mrb[6].mxu1 %vm486_vm0, %v2498_v61  ;;  %v2362_v61 = vrot.slane %v2194_v39, 7 }
 0x30b   : > { %v3714_v62 = vpop.f32.mrb[0].mxu1 }
 0x30c   : > { %v3260_v63 = vpop.f32.mrb[1].mxu1 }
 0x30d   : > { %v2193_v63 = vld [vmem:[%s3582_s26 + $0x2] sm:$0x1] }
 0x30f   : > { %v2039_v0 = vpop.f32.mrb[2].mxu1 }
 0x310   : > { %v2043_v1 = vmul.f32 0.35355338, %v2039_v0  ;;  %v3265_v2 = vpop.f32.mrb[3].mxu1  ;;  %v2470_v0 = vld [vmem:[%s3582_s26 + $0x7] sm:$0x1] }
 0x311   : > { %v2364_v2 = vrot.slane %v2195_v60, 6 }
 0x312   : > { %v3719_v3 = vsel %vm1618_vm10, %v2043_v1, -10000.0  ;;  %v2196_v1 = vld [vmem:[%s3582_s26 + $0xe] sm:$0x1] }
 0x313   : > { %v2315_v4 = vpop.f32.mrb[4].mxu1  ;;  %v2047_v5 = vsel %vm486_vm0, %v3719_v3, -inf }
 0x314   : > { %v2319_v6 = vmul.f32 0.35355338, %v2315_v4  ;;  %2048 = vmax.xlane.f32.xlu1 %v2047_v5  ;;  %v3275_v9 = vpop.f32.mrb[5].mxu1  ;;  %v2363_v4 = vsel %vm1652_vm1, %v2362_v61, %v2193_v63  ;;  %v2471_v5 = vld [vmem:[%s3582_s26 + $0xb] sm:$0x1] }
 0x315   : > { %v2469_v9 = vld [vmem:[%s3582_s26 + $0x3] sm:$0x1] }
 0x316   : > { %v3726_v10 = vsel %vm1618_vm10, %v2319_v6, -10000.0  ;;  %v2638_v6 = vrot.slane %v2470_v0, 7 }
 0x317   : > { %v2591_v11 = vpop.f32.mrb[6].mxu1  ;;  %v2323_v13 = vsel %vm486_vm0, %v3726_v10, -inf }
 0x318   : > { %v2595_v14 = vmul.f32 0.35355338, %v2591_v11  ;;  %2324 = vmax.xlane.f32.xlu1 %v2323_v13  ;;  %v3285_v16 = vpop.f32.mrb[7].mxu1  ;;  %v2197_v11 = vld [vmem:[%s3582_s26 + $0x12] sm:$0x1]  ;;  %v2366_v13 = vrot.slane %v2196_v1, 5 }
 0x319   : > { %v2472_v16 = vld [vmem:[%s3582_s26 + $0xf] sm:$0x1] }
 0x31a   : > { %v3733_v18 = vsel %vm1618_vm10, %v2595_v14, -10000.0  ;;  %v2365_v14 = vsel %vm1655_vm2, %v2364_v2, %v2363_v4  ;;  %v1777_v2 = vmul.f32 1.442695, %v1776_v19 }
 0x31b   : > { %v2599_v20 = vsel %vm486_vm0, %v3733_v18, -inf }
 0x31c   : > { %2600 = vmax.xlane.f32.xlu1 %v2599_v20  ;;  %v2640_v20 = vrot.slane %v2471_v5, 6 }
 0x3a1   : > { %v2049_v22 = vpop.xlane.xlu1 %2048 }
 0x3a2   : > { %v2050_v23 = vmax.f32 %v2046_v21, %v2049_v22  ;;  %v2639_v22 = vsel %vm1652_vm1, %v2638_v6, %v2469_v9 }
 0x3a3   : > { %v2641_v31 = vsel %vm1655_vm2, %v2640_v20, %v2639_v22 }
 0x3a4   : > { %2176 = vst.msk [vmem:[#allocation2 + $0x8] sm:$0xff] %vm477_vm9, %v2050_v23  ;;  %2056 = vperm.xlu1 %3338, %v2050_v23   ;;  %v2051_v53 = vsub.f32 %v2046_v21, %v2050_v23 }
 0x3a5   : > { %v2325_v26 = vpop.xlane.xlu1 %2324 }
 0x3a6   : > { %v2326_v27 = vmax.f32 %v2322_v25, %v2325_v26  ;;  %v2052_v55 = vmul.f32 1.442695, %v2051_v53  ;;  %v2368_v26 = vrot.slane %v2197_v11, 4  ;;  %v2648_v53 = vrot.slane %v2475_v46, 2 }
 0x3a8   : > { %2452 = vst.msk [vmem:[#allocation2 + $0x10] sm:$0xff] %vm477_vm9, %v2326_v27  ;;  %2332 = vperm.xlu1 %3338, %v2326_v27   ;;  %v2327_v56 = vsub.f32 %v2322_v25, %v2326_v27  ;;  %3341 = vpow2.f32 %v2052_v55  ;;  %v2198_v25 = vld [vmem:[%s3582_s26 + $0x16] sm:$0x1]  ;;  %v2367_v27 = vsel %vm1658_vm3, %v2366_v13, %v2365_v14 }
 0x3a9   : > { %v2601_v29 = vpop.xlane.xlu1 %2600  ;;  %v2370_v34 = vrot.slane %v2198_v25, 3  ;;  %v2369_v36 = vsel %vm1661_vm4, %v2368_v26, %v2367_v27 }
 0x3aa   : > { %v3744_v32 = vmax.f32 %v3738_v8, %v2601_v29  ;;  %v2328_v57 = vmul.f32 1.442695, %v2327_v56  ;;  %v2642_v29 = vrot.slane %v2472_v16, 5  ;;  %v2650_v56 = vrot.slane %v2476_v52, 1 }
 0x3ab   : > { %v2371_v45 = vsel %vm1664_vm6, %v2370_v34, %v2369_v36  ;;  %v3407_v36 = vmov 1966171168  }
 0x3ac   : > { %v2603_v38 = vsub.f32 %v3738_v8, %v3744_v32  ;;  %2728 = vst.msk [vmem:[#allocation2 + $0x18] sm:$0xff] %vm477_vm9, %v3744_v32  ;;  %2608 = vperm.xlu1 %3338, %v3744_v32   ;;  %3343 = vpow2.f32 %v2328_v57  ;;  %v2643_v40 = vsel %vm1658_vm3, %v2642_v29, %v2641_v31  ;;  %v2373_v51 = vsel %vm1667_vm7, %v2372_v43, %v2371_v45  ;;  %v2339_v32 = vld [vmem:[#allocation3 + $0x10] sm:$0xff] }
 0x3ad   : > { %v2375_v55 = vsel %vm1670_vm8, %v2374_v49, %v2373_v51 }
 0x3ae   : > { %v2604_v4 = vmul.f32 1.442695, %v2603_v38 }
 0x3b2   : > { %v3767_v58 = vpop.eup %3341 }
 0x3b3   : > { %v2064_v19 = vmul.f32 %v3767_v58, %v2063_v17 }
 0x3b6   : > { %v3770_v59 = vpop.eup %3343 }
 0x3b7   : > { %v2340_v16 = vmul.f32 %v3770_v59, %v2339_v32 }
 0x3d0   : > { %1790 = vadd.xlane.f32.xlu1 %v1789_v54 }
 0x3e1   : > { %2074 = vperm.xlu1 %3338, %v3767_v58   ;;  %v1795_v58 = vld [vmem:[#allocation4] sm:$0xff] }
 0x3e5   : > { %2350 = vperm.xlu1 %3338, %v3770_v59  }
 0x423   : > { %v2057_v21 = vpop.permute.xlu1 %2056 }
 0x424   : > { %v2059_v23 = vsub.f32 %v3719_v3, %v2057_v21  ;;  %v2474_v3 = vld [vmem:[%s3582_s26 + $0x17] sm:$0x1]  ;;  %v2615_v21 = vld [vmem:[#allocation3 + $0x18] sm:$0xff] }
 0x425   : > { %v2646_v47 = vrot.slane %v2474_v3, 3  ;;  %v2744_v3 = vunpack.c.l.s4 %v3407_v36 }
 0x426   : > { %v2060_v30 = vmul.f32 1.442695, %v2059_v23 }
 0x427   : > { %v2333_v33 = vpop.permute.xlu1 %2332 }
 0x428   : > { %3345 = vpow2.f32 %v2060_v30  ;;  %v2335_v35 = vsub.f32 %v3726_v10, %v2333_v33  ;;  %v2645_v10 = vsel %vm1661_vm4, %v2644_v37, %v2643_v40  ;;  %v2745_v37 = vunpack.c.0.s8 %v2744_v3 }
 0x429   : > { %v2647_v54 = vsel %vm1664_vm6, %v2646_v47, %v2645_v10 }
 0x42a   : > { %v2336_v41 = vmul.f32 1.442695, %v2335_v35  ;;  %v2649_v39 = vsel %vm1667_vm7, %v2648_v53, %v2647_v54 }
 0x42b   : > { %v2609_v44 = vpop.permute.xlu1 %2608  ;;  %v2651_v60 = vsel %vm1670_vm8, %v2650_v56, %v2649_v39 }
 0x42c   : > { %3347 = vpow2.f32 %v2336_v41  ;;  %v2611_v48 = vsub.f32 %v3733_v18, %v2609_v44  ;;  %v3834_v41 = vsub.s32 %v2745_v37, %v3563_v7 }
 0x42e   : > { %v2612_v50 = vmul.f32 1.442695, %v2611_v48 }
 0x430   : > { %3349 = vpow2.f32 %v2612_v50 }
 0x431   : > { %3351 = vpow2.f32 %v1777_v2 }
 0x432   : > { %v3346_v57 = vpop.eup %3345  ;;  %3353 = vpow2.f32 %v2604_v4 }
 0x433   : > { %3269 = vmatmul.mubr.msk.f32.vlgmr.msra.gmra.mrb[2].mxu0 %vm486_vm0, %v3346_v57  ;;  %v2065_v18 = vsel %vm486_vm0, %v3346_v57, 0.0  ;;  %v2347_v57 = vld [vmem:[#allocation4 + $0x10] sm:$0xff] }
 0x434   : > { %2066 = vadd.xlane.f32.xlu0 %v2065_v18  ;;  %3277 = vmatpush3.msra.mxu0 %v2375_v55  ;;  %v2071_v55 = vld [vmem:[#allocation4 + $0x8] sm:$0xff] }
 0x435   : > { %3278 = vmatprep.mubr.msk.f32.mxu0 %vm3404_vm5, %v3403_v24  ;;  %3286 = vmatprep.subr.mxu0 %v3403_v24 }
 0x436   : > { %v3348_v61 = vpop.eup %3347 }
 0x437   : > { %3279 = vmatmul.mubr.msk.f32.vlgmr.msra.gmra.mrb[4].mxu0 %vm486_vm0, %v3348_v61  ;;  %v2341_v63 = vsel %vm486_vm0, %v3348_v61, 0.0 }
 0x438   : > { %2342 = vadd.xlane.f32.xlu0 %v2341_v63  ;;  %3287 = vmatpush3.msra.mxu0 %v2651_v60  ;;  %v2623_v63 = vld [vmem:[#allocation4 + $0x18] sm:$0xff] }
 0x439   : > { %3288 = vmatprep.mubr.msk.f32.mxu0 %vm3404_vm5, %v3403_v24  ;;  %v1787_v24 = vld [vmem:[#allocation3] sm:$0xff] }
 0x43a   : > { %v3350_v0 = vpop.eup %3349 }
 0x43b   : > { %3289 = vmatmul.mubr.msk.f32.vlgmr.msra.gmra.mrb[6].mxu0 %vm486_vm0, %v3350_v0  ;;  %v2617_v1 = vsel %vm486_vm0, %v3350_v0, 0.0  ;;  %v3352_v5 = vpop.eup %3351 }
 0x43c   : > { %2618 = vadd.xlane.f32.xlu0 %v2617_v1  ;;  %v3354_v6 = vpop.eup %3353  ;;  %v1788_v9 = vmul.f32 %v3352_v5, %v1787_v24 }
 0x43d   : > { %v2616_v23 = vmul.f32 %v3354_v6, %v2615_v21 }
 0x452   : > { %1798 = vperm.xlu0 %3337, %v3352_v5  }
 0x456   : > { %2626 = vperm.xlu0 %3337, %v3354_v6  }
 0x45d   : > { %v1791_v11 = vpop.xlane.xlu1 %1790 }
 0x45e   : > { %v1792_v13 = vadd.f32 %v1791_v11, %v1788_v9 }
 0x460   : > { %1794 = vst.msk [vmem:[#allocation3] sm:$0xff] %vm477_vm9, %v1792_v13 }
 0x461   : > { %v2075_v35 = vpop.permute.xlu1 %2074 }
 0x462   : > { %v2077_v56 = vmul.f32 %v2075_v35, %v2071_v55 }
 0x465   : > { %v2351_v40 = vpop.permute.xlu1 %2350 }
 0x466   : > { %v2353_v61 = vmul.f32 %v2351_v40, %v2347_v57 }
 0x467   : > { %v2732_v14 = vld [vmem:[#allocation3] sm:$0xff] }
 0x468   : > { %3355 = vrcp.f32 %v2732_v14 }
 0x472   : > { %v3356_v15 = vpop.eup %3355 }
 0x473   : > { %2737 = vperm.xlu1 %3338, %v3356_v15  }
 0x4c1   : > { %v2067_v8 = vpop.xlane.xlu0 %2066 }
 0x4c2   : > { %v2068_v38 = vadd.f32 %v2067_v8, %v2064_v19 }
 0x4c4   : > { %2069 = vst.msk [vmem:[#allocation3 + $0x8] sm:$0xff] %vm477_vm9, %v2068_v38 }
 0x4c5   : > { %v2343_v20 = vpop.xlane.xlu0 %2342 }
 0x4c6   : > { %v2344_v22 = vadd.f32 %v2343_v20, %v2340_v16 }
 0x4c8   : > { %2345 = vst.msk [vmem:[#allocation3 + $0x10] sm:$0xff] %vm477_vm9, %v2344_v22 }
 0x4c9   : > { %v2619_v25 = vpop.xlane.xlu0 %2618 }
 0x4ca   : > { %v2620_v26 = vadd.f32 %v2619_v25, %v2616_v23 }
 0x4cb   : > { %v2809_v27 = vld [vmem:[#allocation3 + $0x8] sm:$0xff] }
 0x4cc   : > { %2621 = vst.msk [vmem:[#allocation3 + $0x18] sm:$0xff] %vm477_vm9, %v2620_v26  ;;  %3357 = vrcp.f32 %v2809_v27 }
 0x4cf   : > { %v2886_v28 = vld [vmem:[#allocation3 + $0x10] sm:$0xff] }
 0x4d0   : > { %3359 = vrcp.f32 %v2886_v28 }
 0x4d1   : > { %v1799_v29 = vpop.permute.xlu0 %1798 }
 0x4d2   : > { %v1801_v30 = vmul.f32 %v1799_v29, %v1795_v58 }
 0x4d3   : > { %v2963_v31 = vld [vmem:[#allocation3 + $0x18] sm:$0xff] }
 0x4d4   : > { %v1898_v59 = vadd.f32 %v3714_v62, %v1801_v30  ;;  %3361 = vrcp.f32 %v2963_v31 }
 0x4d5   : > { %v2627_v0 = vpop.permute.xlu0 %2626 }
 0x4d6   : > { %v3358_v33 = vpop.eup %3357  ;;  %1899 = vst.msk [vmem:[#allocation4] sm:$0xff] %vm486_vm0, %v1898_v59  ;;  %v2629_v5 = vmul.f32 %v2627_v0, %v2623_v63 }
 0x4d7   : > { %2815 = vperm.xlu1 %3338, %v3358_v33  }
 0x4da   : > { %v3360_v12 = vpop.eup %3359 }
 0x4db   : > { %2892 = vperm.xlu1 %3338, %v3360_v12  }
 0x4dd   : > { %v2734_v62 = vld [vmem:[#allocation4] sm:$0xff] }
 0x4de   : > { %v3362_v34 = vpop.eup %3361 }
 0x4df   : > { %2969 = vperm.xlu1 %3338, %v3362_v34  }
 0x4f2   : > { %v2738_v42 = vpop.permute.xlu1 %2737 }
 0x4f3   : > { %v2740_v43 = vmul.f32 %v2738_v42, %v2734_v62 }
 0x4f5   : > { %v2742_v44 = vcombine.high %v2740_v43, %v2740_v43  ;;  %v2749_v45 = vrot.slane %v2740_v43, %v3834_v41 }
 0x4f7   : > { %v2756_v7 = vrot.slane %v2742_v44, %v3834_v41  ;;  %v2757_v46 = vcombine.high %v2749_v45, %v2749_v45  ;;  %v2765_v47 = vrot.slane %v2749_v45, %v3834_v41 }
 0x4f9   : > { %v2758_v48 = vcombine.high %v2756_v7, %v2756_v7  ;;  %v2772_v10 = vrot.slane %v2756_v7, %v3834_v41  ;;  %v2779_v49 = vrot.slane %v2757_v46, %v3834_v41  ;;  %v2787_v50 = vcombine.high %v2765_v47, %v2765_v47  ;;  %2800 = vst.msk [vmem:[%s3840_s30] sm:$0x1] %vm2799_vm11, %v2765_v47 }
 0x4fb   : > { %v2786_v51 = vrot.slane %v2758_v48, %v3834_v41  ;;  %v2788_v52 = vcombine.high %v2772_v10, %v2772_v10  ;;  %v2789_v53 = vcombine.high %v2779_v49, %v2779_v49  ;;  %2801 = vst.msk [vmem:[%s3840_s30 + $0x4] sm:$0x1] %vm2799_vm11, %v2779_v49  ;;  %2802 = vst.msk [vmem:[%s3840_s30 + $0x8] sm:$0x1] %vm2799_vm11, %v2787_v50 }
 0x4fc   : > { %2804 = vst.msk [vmem:[%s3840_s30 + $0x10] sm:$0x1] %vm2799_vm11, %v2772_v10 }
 0x4fd   : > { %v2790_v54 = vcombine.high %v2786_v51, %v2786_v51  ;;  %2803 = vst.msk [vmem:[%s3840_s30 + $0xc] sm:$0x1] %vm2799_vm11, %v2789_v53  ;;  %2805 = vst.msk [vmem:[%s3840_s30 + $0x14] sm:$0x1] %vm2799_vm11, %v2786_v51 }
 0x4fe   : > { %2806 = vst.msk [vmem:[%s3840_s30 + $0x18] sm:$0x1] %vm2799_vm11, %v2788_v52 }
 0x4ff   : > { %2807 = vst.msk [vmem:[%s3840_s30 + $0x1c] sm:$0x1] %vm2799_vm11, %v2790_v54 }
 0x506   : > { %v2170_v39 = vpop.f32.mrb[2].mxu0 }
 0x507   : > { %v2174_v18 = vadd.f32 %v2170_v39, %v2077_v56  ;;  %v3270_v60 = vpop.f32.mrb[3].mxu0 }
 0x509   : > { %2175 = vst.msk [vmem:[#allocation4 + $0x8] sm:$0xff] %vm486_vm0, %v2174_v18 }
 0x50a   : > { %v2446_v1 = vpop.f32.mrb[4].mxu0 }
 0x50b   : > { %v2450_v2 = vadd.f32 %v2446_v1, %v2353_v61  ;;  %v3280_v4 = vpop.f32.mrb[5].mxu0 }
 0x50d   : > { %2451 = vst.msk [vmem:[#allocation4 + $0x10] sm:$0xff] %vm486_vm0, %v2450_v2 }
 0x50e   : > { %v2722_v6 = vpop.f32.mrb[6].mxu0 }
 0x50f   : > { %v2726_v24 = vadd.f32 %v2722_v6, %v2629_v5  ;;  %v3290_v9 = vpop.f32.mrb[7].mxu0 }
 0x510   : > { %v2812_v13 = vld [vmem:[#allocation4 + $0x8] sm:$0xff] }
 0x511   : > { %2727 = vst.msk [vmem:[#allocation4 + $0x18] sm:$0xff] %vm486_vm0, %v2726_v24 }
 0x514   : > { %v2889_v8 = vld [vmem:[#allocation4 + $0x10] sm:$0xff] }
 0x518   : > { %v2966_v28 = vld [vmem:[#allocation4 + $0x18] sm:$0xff] }
 0x556   : > { %v2816_v11 = vpop.permute.xlu1 %2815 }
 0x557   : > { %v2818_v14 = vmul.f32 %v2816_v11, %v2812_v13 }
 0x559   : > { %v2820_v15 = vcombine.high %v2818_v14, %v2818_v14  ;;  %v2827_v17 = vrot.slane %v2818_v14, %v3834_v41 }
 0x55a   : > { %v2893_v19 = vpop.permute.xlu1 %2892 }
 0x55b   : > { %v2834_v32 = vrot.slane %v2820_v15, %v3834_v41  ;;  %v2835_v38 = vcombine.high %v2827_v17, %v2827_v17  ;;  %v2843_v16 = vrot.slane %v2827_v17, %v3834_v41  ;;  %v2895_v20 = vmul.f32 %v2893_v19, %v2889_v8 }
 0x55d   : > { %v2836_v21 = vcombine.high %v2834_v32, %v2834_v32  ;;  %v2850_v22 = vrot.slane %v2834_v32, %v3834_v41  ;;  %v2857_v23 = vrot.slane %v2835_v38, %v3834_v41  ;;  %v2865_v25 = vcombine.high %v2843_v16, %v2843_v16  ;;  %2877 = vst.msk [vmem:[%s3840_s30 + $0x1] sm:$0x1] %vm2799_vm11, %v2843_v16 }
 0x55e   : > { %v2897_v26 = vcombine.high %v2895_v20, %v2895_v20  ;;  %v2904_v27 = vrot.slane %v2895_v20, %v3834_v41  ;;  %v2970_v58 = vpop.permute.xlu1 %2969 }
 0x55f   : > { %v2864_v29 = vrot.slane %v2836_v21, %v3834_v41  ;;  %v2866_v30 = vcombine.high %v2850_v22, %v2850_v22  ;;  %v2867_v31 = vcombine.high %v2857_v23, %v2857_v23  ;;  %2878 = vst.msk [vmem:[%s3840_s30 + $0x5] sm:$0x1] %vm2799_vm11, %v2857_v23  ;;  %2879 = vst.msk [vmem:[%s3840_s30 + $0x9] sm:$0x1] %vm2799_vm11, %v2865_v25 }
 0x560   : > { %2881 = vst.msk [vmem:[%s3840_s30 + $0x11] sm:$0x1] %vm2799_vm11, %v2850_v22  ;;  %v2972_v59 = vmul.f32 %v2970_v58, %v2966_v28  ;;  %v2911_v33 = vrot.slane %v2897_v26, %v3834_v41  ;;  %v2912_v12 = vcombine.high %v2904_v27, %v2904_v27  ;;  %v2920_v34 = vrot.slane %v2904_v27, %v3834_v41 }
 0x561   : > { %v2868_v35 = vcombine.high %v2864_v29, %v2864_v29  ;;  %2880 = vst.msk [vmem:[%s3840_s30 + $0xd] sm:$0x1] %vm2799_vm11, %v2867_v31  ;;  %2882 = vst.msk [vmem:[%s3840_s30 + $0x15] sm:$0x1] %vm2799_vm11, %v2864_v29 }
 0x562   : > { %2883 = vst.msk [vmem:[%s3840_s30 + $0x19] sm:$0x1] %vm2799_vm11, %v2866_v30  ;;  %v2974_v36 = vcombine.high %v2972_v59, %v2972_v59  ;;  %v2981_v3 = vrot.slane %v2972_v59, %v3834_v41  ;;  %v2913_v37 = vcombine.high %v2911_v33, %v2911_v33  ;;  %v2927_v40 = vrot.slane %v2911_v33, %v3834_v41 }
 0x563   : > { %v2934_v62 = vrot.slane %v2912_v12, %v3834_v41  ;;  %v2942_v42 = vcombine.high %v2920_v34, %v2920_v34  ;;  %2954 = vst.msk [vmem:[%s3840_s30 + $0x2] sm:$0x1] %vm2799_vm11, %v2920_v34  ;;  %2884 = vst.msk [vmem:[%s3840_s30 + $0x1d] sm:$0x1] %vm2799_vm11, %v2868_v35 }
 0x564   : > { %v2988_v43 = vrot.slane %v2974_v36, %v3834_v41  ;;  %v2989_v44 = vcombine.high %v2981_v3, %v2981_v3  ;;  %v2997_v45 = vrot.slane %v2981_v3, %v3834_v41  ;;  %v2941_v7 = vrot.slane %v2913_v37, %v3834_v41  ;;  %2958 = vst.msk [vmem:[%s3840_s30 + $0x12] sm:$0x1] %vm2799_vm11, %v2927_v40 }
 0x565   : > { %v2943_v46 = vcombine.high %v2927_v40, %v2927_v40  ;;  %v2944_v47 = vcombine.high %v2934_v62, %v2934_v62  ;;  %2955 = vst.msk [vmem:[%s3840_s30 + $0x6] sm:$0x1] %vm2799_vm11, %v2934_v62  ;;  %2956 = vst.msk [vmem:[%s3840_s30 + $0xa] sm:$0x1] %vm2799_vm11, %v2942_v42 }
 0x566   : > { %v2990_v48 = vcombine.high %v2988_v43, %v2988_v43  ;;  %v3004_v10 = vrot.slane %v2988_v43, %v3834_v41  ;;  %v3011_v49 = vrot.slane %v2989_v44, %v3834_v41  ;;  %v3019_v50 = vcombine.high %v2997_v45, %v2997_v45  ;;  %3031 = vst.msk [vmem:[%s3840_s30 + $0x3] sm:$0x1] %vm2799_vm11, %v2997_v45 }
 0x567   : > { %v2945_v51 = vcombine.high %v2941_v7, %v2941_v7  ;;  %2957 = vst.msk [vmem:[%s3840_s30 + $0xe] sm:$0x1] %vm2799_vm11, %v2944_v47  ;;  %2959 = vst.msk [vmem:[%s3840_s30 + $0x16] sm:$0x1] %vm2799_vm11, %v2941_v7 }
 0x568   : > { %2960 = vst.msk [vmem:[%s3840_s30 + $0x1a] sm:$0x1] %vm2799_vm11, %v2943_v46  ;;  %v3018_v52 = vrot.slane %v2990_v48, %v3834_v41  ;;  %v3020_v53 = vcombine.high %v3004_v10, %v3004_v10  ;;  %v3021_v54 = vcombine.high %v3011_v49, %v3011_v49  ;;  %3032 = vst.msk [vmem:[%s3840_s30 + $0x7] sm:$0x1] %vm2799_vm11, %v3011_v49 }
 0x569   : > { %3033 = vst.msk [vmem:[%s3840_s30 + $0xb] sm:$0x1] %vm2799_vm11, %v3019_v50  ;;  %3035 = vst.msk [vmem:[%s3840_s30 + $0x13] sm:$0x1] %vm2799_vm11, %v3004_v10 }
 0x56a   : > { %2961 = vst.msk [vmem:[%s3840_s30 + $0x1e] sm:$0x1] %vm2799_vm11, %v2945_v51  ;;  %v3022_v55 = vcombine.high %v3018_v52, %v3018_v52  ;;  %3034 = vst.msk [vmem:[%s3840_s30 + $0xf] sm:$0x1] %vm2799_vm11, %v3021_v54 }
 0x56b   : > { %3036 = vst.msk [vmem:[%s3840_s30 + $0x17] sm:$0x1] %vm2799_vm11, %v3018_v52  ;;  %3037 = vst.msk [vmem:[%s3840_s30 + $0x1b] sm:$0x1] %vm2799_vm11, %v3020_v53 }
 0x56c   : > { %3038 = vst.msk [vmem:[%s3840_s30 + $0x1f] sm:$0x1] %vm2799_vm11, %v3022_v55 }
 0x56d PF: > { %s13_s16 = sadd.s32 1, %s3401_s16   ;;  %s3952_s12 = smov %s3389_s13 }
 0x56e   : > { %p10_p10 = scmp.ge.s32.totalorder %s13_s16, 4   ;;  %s3953_s13 = smov %s3467_s21 }
 0x56f   : > { %s3954_s14 = smov %s3397_s15  ;;  %s3955_s15 = smov %s3957_s17 }
 0x570   :  { %12 = sbr.rel (!%p10_p10) target bundleno = 3 (0x3), region = 246 }

</bundles_post_ra>
